<compile_context>
chip_gen: v5e
topology: v5e:2x2
jax: 0.10.0
libtpu: 0.0.40
codegen_flags: <defaults>
</compile_context>

<pallas_src>
import functools

import jax
import jax.numpy as jnp
from jax.experimental import pallas as pl
from jax.experimental.pallas import tpu as pltpu

D_MODEL = 32
NHEAD = 4
HEAD_DIM = D_MODEL // NHEAD
LN_EPS = 1e-5
PROJ_W = 128                       # fused projection lanes: [ q | k | v | pad ]
assert 4 * D_MODEL == PROJ_W       # packing below assumes d_model == 32


def _dot_nt(a, b):
    """a @ b.T via a transposed-RHS contraction (no XLU transpose of b)."""
    return jax.lax.dot_general(a, b, (((1,), (1,)), ((), ())),
                               preferred_element_type=jnp.float32)


def _self_attn_layer_kernel(x_ref, pos_ref, w_ref, vec_ref, out_ref, *, L, BT):
    """One grid step: BT batch elements, full sequence L, d_model = D_MODEL."""
    E, H, DH = D_MODEL, NHEAD, HEAD_DIM
    M = L * BT                                        # rows, ordered (l, b)

    xf = x_ref[...].reshape(M, E)                     # (M, E)
    posf = pos_ref[...].reshape(M, E)

    # Fused, lane-dense input projection -> one 128-lane slab [q | k | v | 0].
    # The 1/sqrt(head_dim) softmax scale is pre-folded into the q columns / bq.
    proj = (jnp.dot(xf, w_ref[0], preferred_element_type=jnp.float32)
            + jnp.dot(posf, w_ref[1], preferred_element_type=jnp.float32)
            + vec_ref[0:1, :])                        # (M, 128)

    q3 = proj[:, 0 * E:1 * E].reshape(L, BT, E)       # (L, BT, E)
    k3 = proj[:, 1 * E:2 * E].reshape(L, BT, E)
    v3 = proj[:, 2 * E:3 * E].reshape(L, BT, E)

    wo_t = w_ref[2][:, :E]                            # (E, E) = Wo^T
    bo = vec_ref[1:2, :E]                             # (1, E)
    gamma = vec_ref[2:3, :E]
    beta = vec_ref[3:4, :E]

    # Batch and heads handled by a small statically-unrolled loop of 2-D MXU
    # ops: exact per-batch attention (no (BT*L)^2 waste, no block-diag mask),
    # no (H, M, DH) transposes, and the head merge is folded into the output
    # projection.  Intended for small BT/H (decoder query self-attention).
    attn_parts = []
    for b in range(BT):
        qb = q3[:, b, :]                              # (L, E)
        kb = k3[:, b, :]
        vb = v3[:, b, :]
        attn_b = None
        for h in range(H):
            sl = slice(h * DH, (h + 1) * DH)
            s_bh = _dot_nt(qb[:, sl], kb[:, sl])      # (L, L), already scaled
            s_bh = s_bh - jnp.max(s_bh, axis=-1, keepdims=True)
            p = jnp.exp(s_bh)
            denom = jnp.sum(p, axis=-1, keepdims=True)
            p = p * pl.reciprocal(denom, approx=False)   # exact: PyTorch parity
            ctx = jnp.dot(p, vb[:, sl], preferred_element_type=jnp.float32)
            part = jnp.dot(ctx, wo_t[sl, :], preferred_element_type=jnp.float32)
            attn_b = part if attn_b is None else attn_b + part
        attn_parts.append(attn_b)                     # (L, E)

    if BT == 1:
        attn = attn_parts[0]                          # (M, E)
    else:
        attn = jnp.stack(attn_parts, axis=1).reshape(M, E)   # back to (l, b) rows

    # Residual (+ output-projection bias) + LayerNorm.
    y = xf + attn + bo
    mean = jnp.mean(y, axis=-1, keepdims=True)
    var = jnp.mean((y - mean) ** 2, axis=-1, keepdims=True)
    y = (y - mean) * jax.lax.rsqrt(var + LN_EPS)
    y = y * gamma + beta

    out_ref[...] = y.reshape(L, 1, BT, E)             # minor dim unchanged


def _multi_tensorcore_chip():
    """True only on v7x-class chips (2 TensorCores); v5e/v6e are single-TC."""
    try:
        kind = jax.devices()[0].device_kind.lower()
    except Exception:
        return False
    return ("v7" in kind) or ("7x" in kind)


@functools.partial(jax.jit, static_argnames=("n_steps",))
def _self_attention_layer_impl(tgt, query_pos, w_pack, vec_pack, *, n_steps):
    L, B, E = tgt.shape
    BT = B // n_steps
    kernel = functools.partial(_self_attn_layer_kernel, L=L, BT=BT)

    out = pl.pallas_call(
        kernel,
        out_shape=jax.ShapeDtypeStruct((L, n_steps, BT, E), jnp.float32),
        grid_spec=pltpu.PrefetchScalarGridSpec(
            num_scalar_prefetch=0,
            grid=(n_steps,),
            in_specs=[
                pl.BlockSpec((L, BT, E), lambda s: (0, s, 0)),      # tgt (split in spec)
                pl.BlockSpec((L, BT, E), lambda s: (0, s, 0)),      # query_pos
                pl.BlockSpec((3, E, PROJ_W), lambda s: (0, 0, 0)),  # packed weights
                pl.BlockSpec((8, PROJ_W), lambda s: (0, 0)),        # packed bias/LN vectors
            ],
            out_specs=pl.BlockSpec((L, 1, BT, E), lambda s: (0, s, 0, 0)),
        ),
        compiler_params=pltpu.CompilerParams(
            dimension_semantics=("parallel",)),
    )(tgt, query_pos, w_pack, vec_pack)

    return out.reshape(L, B, E)                       # contiguous -> free reshape


def self_attention_layer(tgt, query_pos, packed):
    """tgt, query_pos: (L, B, E) float32. Returns LayerNorm(tgt + SelfAttn)."""
    w_pack, vec_pack = packed
    L, B, E = tgt.shape
    assert E == D_MODEL

    # 2 grid steps only on multi-TC chips (v7x) and only when the per-step batch
    # slice keeps the BlockSpec sublane-aligned; on single-TC v5e/v6e the grid is
    # a serial loop, so a single step avoids ~0.35us/step fixed overhead.
    n_steps = 1
    if _multi_tensorcore_chip() and B % 2 == 0 and (B // 2) % 8 == 0:
        n_steps = 2
    return _self_attention_layer_impl(tgt, query_pos, w_pack, vec_pack,
                                      n_steps=n_steps)


# ----------------------------- parameters ------------------------------------

def _xavier_uniform(key, shape):
    fan_out, fan_in = shape
    bound = jnp.sqrt(6.0 / (fan_in + fan_out))
    return jax.random.uniform(key, shape, jnp.float32, -bound, bound)


def make_params(key, d_model=D_MODEL):
    """Raw params mirroring nn.MultiheadAttention + LayerNorm defaults."""
    k_in, k_out = jax.random.split(key)
    in_proj_w = _xavier_uniform(k_in, (3 * d_model, d_model))
    out_proj_w = _xavier_uniform(k_out, (d_model, d_model))

    wq_t = in_proj_w[0 * d_model:1 * d_model].T
    wk_t = in_proj_w[1 * d_model:2 * d_model].T
    wv_t = in_proj_w[2 * d_model:3 * d_model].T
    wo_t = out_proj_w.T

    zeros_row = jnp.zeros((1, d_model), jnp.float32)
    ones_row = jnp.ones((1, d_model), jnp.float32)
    return (wq_t, wk_t, wv_t,
            zeros_row, zeros_row, zeros_row,          # bq, bk, bv
            wo_t, zeros_row,                          # Wo^T, bo
            ones_row, zeros_row)                      # LN gamma, beta


def pack_params(params):
    """One-time packing into the kernel's fused operands (scale folded into Wq)."""
    wq_t, wk_t, wv_t, bq, bk, bv, wo_t, bo, gamma, beta = params
    E = D_MODEL
    scale = 1.0 / float(HEAD_DIM) ** 0.5
    wq_s = wq_t * scale                               # fold softmax scale offline
    bq_s = bq * scale
    zE = jnp.zeros((E, E), jnp.float32)

    w_all = jnp.concatenate([wq_s, wk_t, wv_t, zE], axis=1)     # (E, 128) for x
    w_qk0 = jnp.concatenate([wq_s, wk_t, zE, zE], axis=1)       # (E, 128) for pos
    w_out = jnp.concatenate([wo_t, zE, zE, zE], axis=1)         # (E, 128)
    w_pack = jnp.stack([w_all, w_qk0, w_out], axis=0)           # (3, E, 128)

    def row(v):                                                 # (1, E) -> (1, 128)
        return jnp.concatenate([v, jnp.zeros((1, PROJ_W - E), jnp.float32)], axis=1)

    in_bias = jnp.concatenate([bq_s, bk, bv, jnp.zeros((1, E), jnp.float32)], axis=1)
    vec_pack = jnp.concatenate(
        [in_bias, row(bo), row(gamma), row(beta),
         jnp.zeros((4, PROJ_W), jnp.float32)], axis=0)          # (8, 128)
    return w_pack, vec_pack


# ----------------------------- reference -------------------------------------

def _reference(tgt, query_pos, params):
    """Pure-JAX reference (matches PyTorch forward_post with dropout=0)."""
    with jax.default_matmul_precision("highest"):
        wq_t, wk_t, wv_t, bq, bk, bv, wo_t, bo, gamma, beta = params
        L, B, E = tgt.shape
        qk_in = tgt + query_pos
        q = qk_in @ wq_t + bq
        k = qk_in @ wk_t + bk
        v = tgt @ wv_t + bv

        def split_heads(t):  # (L, B, E) -> (B, H, L, dh)
            return jnp.transpose(t.reshape(L, B, NHEAD, HEAD_DIM), (1, 2, 0, 3))

        qh, kh, vh = split_heads(q), split_heads(k), split_heads(v)
        scores = jnp.einsum("bhqd,bhkd->bhqk", qh, kh) / jnp.sqrt(jnp.float32(HEAD_DIM))
        probs = jax.nn.softmax(scores, axis=-1)
        o = jnp.einsum("bhqk,bhkd->bhqd", probs, vh)
        o = jnp.transpose(o, (2, 0, 1, 3)).reshape(L, B, E)
        attn_out = o @ wo_t + bo
        y = tgt + attn_out
        mean = jnp.mean(y, axis=-1, keepdims=True)
        var = jnp.mean((y - mean) ** 2, axis=-1, keepdims=True)
        return (y - mean) * jax.lax.rsqrt(var + LN_EPS) * gamma[0] + beta[0]


if __name__ == "__main__":
    key = jax.random.PRNGKey(0)
    k_p, k_x, k_pos = jax.random.split(key, 3)

    L, B, E = 8, 2, D_MODEL                      # seq=8, batch=2, d_model=32, nhead=4
    params = make_params(k_p, E)
    packed = pack_params(params)
    tgt = jax.random.normal(k_x, (L, B, E), jnp.float32)
    query_pos = jax.random.normal(k_pos, (L, B, E), jnp.float32)

    out = self_attention_layer(tgt, query_pos, packed)
    out = jax.block_until_ready(out)

    ref = _reference(tgt, query_pos, params)
    assert out.shape == (L, B, E)
    # Exact softmax reciprocal + f32 matmuls -> tolerance back to 1e-4.
    assert jnp.allclose(out, ref, rtol=1e-4, atol=1e-4), "mismatch vs pure-JAX reference"

    print("KERNEL_OK")
</pallas_src>

<mosaic_0001>
module attributes {stable_mosaic.version = 11 : i64} {
  func.func @_self_attn_layer_kernel(%arg0: i32, %arg1: memref<8x2x32xf32, #tpu.memory_space<vmem>>, %arg2: memref<8x2x32xf32, #tpu.memory_space<vmem>>, %arg3: memref<3x32x128xf32, #tpu.memory_space<vmem>>, %arg4: memref<8x128xf32, #tpu.memory_space<vmem>>, %arg5: memref<8x1x2x32xf32, #tpu.memory_space<vmem>>) attributes {dimension_semantics = [#tpu.dimension_semantics<parallel>], iteration_bounds = array<i64: 1>, scalar_prefetch = 0 : i64, scratch_operands = 0 : i64, tpu.core_type = #tpu.core_type<tc>, window_params = [{transform_indices = @transform_0, window_bounds = array<i64: 8, 2, 32>}, {transform_indices = @transform_1, window_bounds = array<i64: 8, 2, 32>}, {pipeline_mode = #tpu.pipeline_mode<synchronous>, transform_indices = @transform_2, window_bounds = array<i64: 3, 32, 128>}, {pipeline_mode = #tpu.pipeline_mode<synchronous>, transform_indices = @transform_3, window_bounds = array<i64: 8, 128>}, {transform_indices = @transform_4, window_bounds = array<i64: 8, 1, 2, 32>}]} {
    %c0 = arith.constant 0 : index
    %c0_0 = arith.constant 0 : index
    %c0_1 = arith.constant 0 : index
    %0 = vector.load %arg1[%c0, %c0_0, %c0_1] : memref<8x2x32xf32, #tpu.memory_space<vmem>>, vector<8x2x32xf32>
    %1 = vector.shape_cast %0 : vector<8x2x32xf32> to vector<16x32xf32>
    %c0_2 = arith.constant 0 : index
    %c0_3 = arith.constant 0 : index
    %c0_4 = arith.constant 0 : index
    %2 = vector.load %arg2[%c0_2, %c0_3, %c0_4] : memref<8x2x32xf32, #tpu.memory_space<vmem>>, vector<8x2x32xf32>
    %3 = vector.shape_cast %2 : vector<8x2x32xf32> to vector<16x32xf32>
    %c0_5 = arith.constant 0 : index
    %c0_6 = arith.constant 0 : index
    %c0_7 = arith.constant 0 : index
    %4 = vector.load %arg3[%c0_5, %c0_6, %c0_7] : memref<3x32x128xf32, #tpu.memory_space<vmem>>, vector<1x32x128xf32>
    %5 = vector.shape_cast %4 : vector<1x32x128xf32> to vector<32x128xf32>
    %cst = arith.constant dense<0.000000e+00> : vector<16x128xf32>
    %6 = tpu.matmul %1, %5, %cst {dimension_numbers = #tpu.dot_dimension_numbers<[1], [0], [0], [1], [0, 0, 1, 1], [], []>} : vector<16x32xf32>, vector<32x128xf32>, vector<16x128xf32> -> vector<16x128xf32>
    %c1 = arith.constant 1 : index
    %c0_8 = arith.constant 0 : index
    %c0_9 = arith.constant 0 : index
    %7 = vector.load %arg3[%c1, %c0_8, %c0_9] : memref<3x32x128xf32, #tpu.memory_space<vmem>>, vector<1x32x128xf32>
    %8 = vector.shape_cast %7 : vector<1x32x128xf32> to vector<32x128xf32>
    %cst_10 = arith.constant dense<0.000000e+00> : vector<16x128xf32>
    %9 = tpu.matmul %3, %8, %cst_10 {dimension_numbers = #tpu.dot_dimension_numbers<[1], [0], [0], [1], [0, 0, 1, 1], [], []>} : vector<16x32xf32>, vector<32x128xf32>, vector<16x128xf32> -> vector<16x128xf32>
    %10 = arith.addf %6, %9 : vector<16x128xf32>
    %c0_11 = arith.constant 0 : index
    %c0_12 = arith.constant 0 : index
    %11 = vector.load %arg4[%c0_11, %c0_12] : memref<8x128xf32, #tpu.memory_space<vmem>>, vector<1x128xf32>
    %12 = vector.broadcast %11 : vector<1x128xf32> to vector<16x128xf32>
    %13 = arith.addf %10, %12 : vector<16x128xf32>
    %14 = vector.extract_strided_slice %13 {offsets = [0, 0], sizes = [16, 32], strides = [1, 1]} : vector<16x128xf32> to vector<16x32xf32>
    %15 = vector.shape_cast %14 : vector<16x32xf32> to vector<8x2x32xf32>
    %16 = vector.extract_strided_slice %13 {offsets = [0, 32], sizes = [16, 32], strides = [1, 1]} : vector<16x128xf32> to vector<16x32xf32>
    %17 = vector.shape_cast %16 : vector<16x32xf32> to vector<8x2x32xf32>
    %18 = vector.extract_strided_slice %13 {offsets = [0, 64], sizes = [16, 32], strides = [1, 1]} : vector<16x128xf32> to vector<16x32xf32>
    %19 = vector.shape_cast %18 : vector<16x32xf32> to vector<8x2x32xf32>
    %c2 = arith.constant 2 : index
    %c0_13 = arith.constant 0 : index
    %c0_14 = arith.constant 0 : index
    %20 = vector.load %arg3[%c2, %c0_13, %c0_14] : memref<3x32x128xf32, #tpu.memory_space<vmem>>, vector<1x32x128xf32>
    %21 = vector.shape_cast %20 : vector<1x32x128xf32> to vector<32x128xf32>
    %22 = vector.extract_strided_slice %21 {offsets = [0, 0], sizes = [32, 32], strides = [1, 1]} : vector<32x128xf32> to vector<32x32xf32>
    %c1_15 = arith.constant 1 : index
    %c0_16 = arith.constant 0 : index
    %23 = vector.load %arg4[%c1_15, %c0_16] : memref<8x128xf32, #tpu.memory_space<vmem>>, vector<1x32xf32>
    %c2_17 = arith.constant 2 : index
    %c0_18 = arith.constant 0 : index
    %24 = vector.load %arg4[%c2_17, %c0_18] : memref<8x128xf32, #tpu.memory_space<vmem>>, vector<1x32xf32>
    %c3 = arith.constant 3 : index
    %c0_19 = arith.constant 0 : index
    %25 = vector.load %arg4[%c3, %c0_19] : memref<8x128xf32, #tpu.memory_space<vmem>>, vector<1x32xf32>
    %26 = vector.extract_strided_slice %15 {offsets = [0, 0, 0], sizes = [8, 1, 32], strides = [1, 1, 1]} : vector<8x2x32xf32> to vector<8x1x32xf32>
    %27 = vector.shape_cast %26 : vector<8x1x32xf32> to vector<8x32xf32>
    %28 = vector.extract_strided_slice %17 {offsets = [0, 0, 0], sizes = [8, 1, 32], strides = [1, 1, 1]} : vector<8x2x32xf32> to vector<8x1x32xf32>
    %29 = vector.shape_cast %28 : vector<8x1x32xf32> to vector<8x32xf32>
    %30 = vector.extract_strided_slice %19 {offsets = [0, 0, 0], sizes = [8, 1, 32], strides = [1, 1, 1]} : vector<8x2x32xf32> to vector<8x1x32xf32>
    %31 = vector.shape_cast %30 : vector<8x1x32xf32> to vector<8x32xf32>
    %32 = vector.extract_strided_slice %27 {offsets = [0, 0], sizes = [8, 8], strides = [1, 1]} : vector<8x32xf32> to vector<8x8xf32>
    %33 = vector.extract_strided_slice %29 {offsets = [0, 0], sizes = [8, 8], strides = [1, 1]} : vector<8x32xf32> to vector<8x8xf32>
    %cst_20 = arith.constant dense<0.000000e+00> : vector<8x8xf32>
    %34 = tpu.matmul %32, %33, %cst_20 {dimension_numbers = #tpu.dot_dimension_numbers<[1], [1], [0], [0], [0, 0, 1, 0], [], []>} : vector<8x8xf32>, vector<8x8xf32>, vector<8x8xf32> -> vector<8x8xf32>
    %cst_21 = arith.constant dense<0xFF800000> : vector<8xf32>
    %35 = vector.multi_reduction <maximumf>, %34, %cst_21 [1] : vector<8x8xf32> to vector<8xf32>
    %36 = vector.shape_cast %35 : vector<8xf32> to vector<8x1xf32>
    %37 = vector.broadcast %36 : vector<8x1xf32> to vector<8x8xf32>
    %38 = arith.subf %34, %37 : vector<8x8xf32>
    %39 = math.exp %38 : vector<8x8xf32>
    %cst_22 = arith.constant dense<0.000000e+00> : vector<8xf32>
    %40 = vector.multi_reduction <add>, %39, %cst_22 [1] : vector<8x8xf32> to vector<8xf32>
    %41 = vector.shape_cast %40 : vector<8xf32> to vector<8x1xf32>
    %42 = tpu.reciprocal %41 : vector<8x1xf32> -> vector<8x1xf32>
    %43 = vector.broadcast %42 : vector<8x1xf32> to vector<8x8xf32>
    %44 = arith.mulf %39, %43 : vector<8x8xf32>
    %45 = vector.extract_strided_slice %31 {offsets = [0, 0], sizes = [8, 8], strides = [1, 1]} : vector<8x32xf32> to vector<8x8xf32>
    %cst_23 = arith.constant dense<0.000000e+00> : vector<8x8xf32>
    %46 = tpu.matmul %44, %45, %cst_23 {dimension_numbers = #tpu.dot_dimension_numbers<[1], [0], [0], [1], [0, 0, 1, 1], [], []>} : vector<8x8xf32>, vector<8x8xf32>, vector<8x8xf32> -> vector<8x8xf32>
    %47 = vector.extract_strided_slice %22 {offsets = [0, 0], sizes = [8, 32], strides = [1, 1]} : vector<32x32xf32> to vector<8x32xf32>
    %cst_24 = arith.constant dense<0.000000e+00> : vector<8x32xf32>
    %48 = tpu.matmul %46, %47, %cst_24 {dimension_numbers = #tpu.dot_dimension_numbers<[1], [0], [0], [1], [0, 0, 1, 1], [], []>} : vector<8x8xf32>, vector<8x32xf32>, vector<8x32xf32> -> vector<8x32xf32>
    %49 = vector.extract_strided_slice %27 {offsets = [0, 8], sizes = [8, 8], strides = [1, 1]} : vector<8x32xf32> to vector<8x8xf32>
    %50 = vector.extract_strided_slice %29 {offsets = [0, 8], sizes = [8, 8], strides = [1, 1]} : vector<8x32xf32> to vector<8x8xf32>
    %cst_25 = arith.constant dense<0.000000e+00> : vector<8x8xf32>
    %51 = tpu.matmul %49, %50, %cst_25 {dimension_numbers = #tpu.dot_dimension_numbers<[1], [1], [0], [0], [0, 0, 1, 0], [], []>} : vector<8x8xf32>, vector<8x8xf32>, vector<8x8xf32> -> vector<8x8xf32>
    %cst_26 = arith.constant dense<0xFF800000> : vector<8xf32>
    %52 = vector.multi_reduction <maximumf>, %51, %cst_26 [1] : vector<8x8xf32> to vector<8xf32>
    %53 = vector.shape_cast %52 : vector<8xf32> to vector<8x1xf32>
    %54 = vector.broadcast %53 : vector<8x1xf32> to vector<8x8xf32>
    %55 = arith.subf %51, %54 : vector<8x8xf32>
    %56 = math.exp %55 : vector<8x8xf32>
    %cst_27 = arith.constant dense<0.000000e+00> : vector<8xf32>
    %57 = vector.multi_reduction <add>, %56, %cst_27 [1] : vector<8x8xf32> to vector<8xf32>
    %58 = vector.shape_cast %57 : vector<8xf32> to vector<8x1xf32>
    %59 = tpu.reciprocal %58 : vector<8x1xf32> -> vector<8x1xf32>
    %60 = vector.broadcast %59 : vector<8x1xf32> to vector<8x8xf32>
    %61 = arith.mulf %56, %60 : vector<8x8xf32>
    %62 = vector.extract_strided_slice %31 {offsets = [0, 8], sizes = [8, 8], strides = [1, 1]} : vector<8x32xf32> to vector<8x8xf32>
    %cst_28 = arith.constant dense<0.000000e+00> : vector<8x8xf32>
    %63 = tpu.matmul %61, %62, %cst_28 {dimension_numbers = #tpu.dot_dimension_numbers<[1], [0], [0], [1], [0, 0, 1, 1], [], []>} : vector<8x8xf32>, vector<8x8xf32>, vector<8x8xf32> -> vector<8x8xf32>
    %64 = vector.extract_strided_slice %22 {offsets = [8, 0], sizes = [8, 32], strides = [1, 1]} : vector<32x32xf32> to vector<8x32xf32>
    %cst_29 = arith.constant dense<0.000000e+00> : vector<8x32xf32>
    %65 = tpu.matmul %63, %64, %cst_29 {dimension_numbers = #tpu.dot_dimension_numbers<[1], [0], [0], [1], [0, 0, 1, 1], [], []>} : vector<8x8xf32>, vector<8x32xf32>, vector<8x32xf32> -> vector<8x32xf32>
    %66 = arith.addf %48, %65 : vector<8x32xf32>
    %67 = vector.extract_strided_slice %27 {offsets = [0, 16], sizes = [8, 8], strides = [1, 1]} : vector<8x32xf32> to vector<8x8xf32>
    %68 = vector.extract_strided_slice %29 {offsets = [0, 16], sizes = [8, 8], strides = [1, 1]} : vector<8x32xf32> to vector<8x8xf32>
    %cst_30 = arith.constant dense<0.000000e+00> : vector<8x8xf32>
    %69 = tpu.matmul %67, %68, %cst_30 {dimension_numbers = #tpu.dot_dimension_numbers<[1], [1], [0], [0], [0, 0, 1, 0], [], []>} : vector<8x8xf32>, vector<8x8xf32>, vector<8x8xf32> -> vector<8x8xf32>
    %cst_31 = arith.constant dense<0xFF800000> : vector<8xf32>
    %70 = vector.multi_reduction <maximumf>, %69, %cst_31 [1] : vector<8x8xf32> to vector<8xf32>
    %71 = vector.shape_cast %70 : vector<8xf32> to vector<8x1xf32>
    %72 = vector.broadcast %71 : vector<8x1xf32> to vector<8x8xf32>
    %73 = arith.subf %69, %72 : vector<8x8xf32>
    %74 = math.exp %73 : vector<8x8xf32>
    %cst_32 = arith.constant dense<0.000000e+00> : vector<8xf32>
    %75 = vector.multi_reduction <add>, %74, %cst_32 [1] : vector<8x8xf32> to vector<8xf32>
    %76 = vector.shape_cast %75 : vector<8xf32> to vector<8x1xf32>
    %77 = tpu.reciprocal %76 : vector<8x1xf32> -> vector<8x1xf32>
    %78 = vector.broadcast %77 : vector<8x1xf32> to vector<8x8xf32>
    %79 = arith.mulf %74, %78 : vector<8x8xf32>
    %80 = vector.extract_strided_slice %31 {offsets = [0, 16], sizes = [8, 8], strides = [1, 1]} : vector<8x32xf32> to vector<8x8xf32>
    %cst_33 = arith.constant dense<0.000000e+00> : vector<8x8xf32>
    %81 = tpu.matmul %79, %80, %cst_33 {dimension_numbers = #tpu.dot_dimension_numbers<[1], [0], [0], [1], [0, 0, 1, 1], [], []>} : vector<8x8xf32>, vector<8x8xf32>, vector<8x8xf32> -> vector<8x8xf32>
    %82 = vector.extract_strided_slice %22 {offsets = [16, 0], sizes = [8, 32], strides = [1, 1]} : vector<32x32xf32> to vector<8x32xf32>
    %cst_34 = arith.constant dense<0.000000e+00> : vector<8x32xf32>
    %83 = tpu.matmul %81, %82, %cst_34 {dimension_numbers = #tpu.dot_dimension_numbers<[1], [0], [0], [1], [0, 0, 1, 1], [], []>} : vector<8x8xf32>, vector<8x32xf32>, vector<8x32xf32> -> vector<8x32xf32>
    %84 = arith.addf %66, %83 : vector<8x32xf32>
    %85 = vector.extract_strided_slice %27 {offsets = [0, 24], sizes = [8, 8], strides = [1, 1]} : vector<8x32xf32> to vector<8x8xf32>
    %86 = vector.extract_strided_slice %29 {offsets = [0, 24], sizes = [8, 8], strides = [1, 1]} : vector<8x32xf32> to vector<8x8xf32>
    %cst_35 = arith.constant dense<0.000000e+00> : vector<8x8xf32>
    %87 = tpu.matmul %85, %86, %cst_35 {dimension_numbers = #tpu.dot_dimension_numbers<[1], [1], [0], [0], [0, 0, 1, 0], [], []>} : vector<8x8xf32>, vector<8x8xf32>, vector<8x8xf32> -> vector<8x8xf32>
    %cst_36 = arith.constant dense<0xFF800000> : vector<8xf32>
    %88 = vector.multi_reduction <maximumf>, %87, %cst_36 [1] : vector<8x8xf32> to vector<8xf32>
    %89 = vector.shape_cast %88 : vector<8xf32> to vector<8x1xf32>
    %90 = vector.broadcast %89 : vector<8x1xf32> to vector<8x8xf32>
    %91 = arith.subf %87, %90 : vector<8x8xf32>
    %92 = math.exp %91 : vector<8x8xf32>
    %cst_37 = arith.constant dense<0.000000e+00> : vector<8xf32>
    %93 = vector.multi_reduction <add>, %92, %cst_37 [1] : vector<8x8xf32> to vector<8xf32>
    %94 = vector.shape_cast %93 : vector<8xf32> to vector<8x1xf32>
    %95 = tpu.reciprocal %94 : vector<8x1xf32> -> vector<8x1xf32>
    %96 = vector.broadcast %95 : vector<8x1xf32> to vector<8x8xf32>
    %97 = arith.mulf %92, %96 : vector<8x8xf32>
    %98 = vector.extract_strided_slice %31 {offsets = [0, 24], sizes = [8, 8], strides = [1, 1]} : vector<8x32xf32> to vector<8x8xf32>
    %cst_38 = arith.constant dense<0.000000e+00> : vector<8x8xf32>
    %99 = tpu.matmul %97, %98, %cst_38 {dimension_numbers = #tpu.dot_dimension_numbers<[1], [0], [0], [1], [0, 0, 1, 1], [], []>} : vector<8x8xf32>, vector<8x8xf32>, vector<8x8xf32> -> vector<8x8xf32>
    %100 = vector.extract_strided_slice %22 {offsets = [24, 0], sizes = [8, 32], strides = [1, 1]} : vector<32x32xf32> to vector<8x32xf32>
    %cst_39 = arith.constant dense<0.000000e+00> : vector<8x32xf32>
    %101 = tpu.matmul %99, %100, %cst_39 {dimension_numbers = #tpu.dot_dimension_numbers<[1], [0], [0], [1], [0, 0, 1, 1], [], []>} : vector<8x8xf32>, vector<8x32xf32>, vector<8x32xf32> -> vector<8x32xf32>
    %102 = arith.addf %84, %101 : vector<8x32xf32>
    %103 = vector.extract_strided_slice %15 {offsets = [0, 1, 0], sizes = [8, 1, 32], strides = [1, 1, 1]} : vector<8x2x32xf32> to vector<8x1x32xf32>
    %104 = vector.shape_cast %103 : vector<8x1x32xf32> to vector<8x32xf32>
    %105 = vector.extract_strided_slice %17 {offsets = [0, 1, 0], sizes = [8, 1, 32], strides = [1, 1, 1]} : vector<8x2x32xf32> to vector<8x1x32xf32>
    %106 = vector.shape_cast %105 : vector<8x1x32xf32> to vector<8x32xf32>
    %107 = vector.extract_strided_slice %19 {offsets = [0, 1, 0], sizes = [8, 1, 32], strides = [1, 1, 1]} : vector<8x2x32xf32> to vector<8x1x32xf32>
    %108 = vector.shape_cast %107 : vector<8x1x32xf32> to vector<8x32xf32>
    %109 = vector.extract_strided_slice %104 {offsets = [0, 0], sizes = [8, 8], strides = [1, 1]} : vector<8x32xf32> to vector<8x8xf32>
    %110 = vector.extract_strided_slice %106 {offsets = [0, 0], sizes = [8, 8], strides = [1, 1]} : vector<8x32xf32> to vector<8x8xf32>
    %cst_40 = arith.constant dense<0.000000e+00> : vector<8x8xf32>
    %111 = tpu.matmul %109, %110, %cst_40 {dimension_numbers = #tpu.dot_dimension_numbers<[1], [1], [0], [0], [0, 0, 1, 0], [], []>} : vector<8x8xf32>, vector<8x8xf32>, vector<8x8xf32> -> vector<8x8xf32>
    %cst_41 = arith.constant dense<0xFF800000> : vector<8xf32>
    %112 = vector.multi_reduction <maximumf>, %111, %cst_41 [1] : vector<8x8xf32> to vector<8xf32>
    %113 = vector.shape_cast %112 : vector<8xf32> to vector<8x1xf32>
    %114 = vector.broadcast %113 : vector<8x1xf32> to vector<8x8xf32>
    %115 = arith.subf %111, %114 : vector<8x8xf32>
    %116 = math.exp %115 : vector<8x8xf32>
    %cst_42 = arith.constant dense<0.000000e+00> : vector<8xf32>
    %117 = vector.multi_reduction <add>, %116, %cst_42 [1] : vector<8x8xf32> to vector<8xf32>
    %118 = vector.shape_cast %117 : vector<8xf32> to vector<8x1xf32>
    %119 = tpu.reciprocal %118 : vector<8x1xf32> -> vector<8x1xf32>
    %120 = vector.broadcast %119 : vector<8x1xf32> to vector<8x8xf32>
    %121 = arith.mulf %116, %120 : vector<8x8xf32>
    %122 = vector.extract_strided_slice %108 {offsets = [0, 0], sizes = [8, 8], strides = [1, 1]} : vector<8x32xf32> to vector<8x8xf32>
    %cst_43 = arith.constant dense<0.000000e+00> : vector<8x8xf32>
    %123 = tpu.matmul %121, %122, %cst_43 {dimension_numbers = #tpu.dot_dimension_numbers<[1], [0], [0], [1], [0, 0, 1, 1], [], []>} : vector<8x8xf32>, vector<8x8xf32>, vector<8x8xf32> -> vector<8x8xf32>
    %124 = vector.extract_strided_slice %22 {offsets = [0, 0], sizes = [8, 32], strides = [1, 1]} : vector<32x32xf32> to vector<8x32xf32>
    %cst_44 = arith.constant dense<0.000000e+00> : vector<8x32xf32>
    %125 = tpu.matmul %123, %124, %cst_44 {dimension_numbers = #tpu.dot_dimension_numbers<[1], [0], [0], [1], [0, 0, 1, 1], [], []>} : vector<8x8xf32>, vector<8x32xf32>, vector<8x32xf32> -> vector<8x32xf32>
    %126 = vector.extract_strided_slice %104 {offsets = [0, 8], sizes = [8, 8], strides = [1, 1]} : vector<8x32xf32> to vector<8x8xf32>
    %127 = vector.extract_strided_slice %106 {offsets = [0, 8], sizes = [8, 8], strides = [1, 1]} : vector<8x32xf32> to vector<8x8xf32>
    %cst_45 = arith.constant dense<0.000000e+00> : vector<8x8xf32>
    %128 = tpu.matmul %126, %127, %cst_45 {dimension_numbers = #tpu.dot_dimension_numbers<[1], [1], [0], [0], [0, 0, 1, 0], [], []>} : vector<8x8xf32>, vector<8x8xf32>, vector<8x8xf32> -> vector<8x8xf32>
    %cst_46 = arith.constant dense<0xFF800000> : vector<8xf32>
    %129 = vector.multi_reduction <maximumf>, %128, %cst_46 [1] : vector<8x8xf32> to vector<8xf32>
    %130 = vector.shape_cast %129 : vector<8xf32> to vector<8x1xf32>
    %131 = vector.broadcast %130 : vector<8x1xf32> to vector<8x8xf32>
    %132 = arith.subf %128, %131 : vector<8x8xf32>
    %133 = math.exp %132 : vector<8x8xf32>
    %cst_47 = arith.constant dense<0.000000e+00> : vector<8xf32>
    %134 = vector.multi_reduction <add>, %133, %cst_47 [1] : vector<8x8xf32> to vector<8xf32>
    %135 = vector.shape_cast %134 : vector<8xf32> to vector<8x1xf32>
    %136 = tpu.reciprocal %135 : vector<8x1xf32> -> vector<8x1xf32>
    %137 = vector.broadcast %136 : vector<8x1xf32> to vector<8x8xf32>
    %138 = arith.mulf %133, %137 : vector<8x8xf32>
    %139 = vector.extract_strided_slice %108 {offsets = [0, 8], sizes = [8, 8], strides = [1, 1]} : vector<8x32xf32> to vector<8x8xf32>
    %cst_48 = arith.constant dense<0.000000e+00> : vector<8x8xf32>
    %140 = tpu.matmul %138, %139, %cst_48 {dimension_numbers = #tpu.dot_dimension_numbers<[1], [0], [0], [1], [0, 0, 1, 1], [], []>} : vector<8x8xf32>, vector<8x8xf32>, vector<8x8xf32> -> vector<8x8xf32>
    %141 = vector.extract_strided_slice %22 {offsets = [8, 0], sizes = [8, 32], strides = [1, 1]} : vector<32x32xf32> to vector<8x32xf32>
    %cst_49 = arith.constant dense<0.000000e+00> : vector<8x32xf32>
    %142 = tpu.matmul %140, %141, %cst_49 {dimension_numbers = #tpu.dot_dimension_numbers<[1], [0], [0], [1], [0, 0, 1, 1], [], []>} : vector<8x8xf32>, vector<8x32xf32>, vector<8x32xf32> -> vector<8x32xf32>
    %143 = arith.addf %125, %142 : vector<8x32xf32>
    %144 = vector.extract_strided_slice %104 {offsets = [0, 16], sizes = [8, 8], strides = [1, 1]} : vector<8x32xf32> to vector<8x8xf32>
    %145 = vector.extract_strided_slice %106 {offsets = [0, 16], sizes = [8, 8], strides = [1, 1]} : vector<8x32xf32> to vector<8x8xf32>
    %cst_50 = arith.constant dense<0.000000e+00> : vector<8x8xf32>
    %146 = tpu.matmul %144, %145, %cst_50 {dimension_numbers = #tpu.dot_dimension_numbers<[1], [1], [0], [0], [0, 0, 1, 0], [], []>} : vector<8x8xf32>, vector<8x8xf32>, vector<8x8xf32> -> vector<8x8xf32>
    %cst_51 = arith.constant dense<0xFF800000> : vector<8xf32>
    %147 = vector.multi_reduction <maximumf>, %146, %cst_51 [1] : vector<8x8xf32> to vector<8xf32>
    %148 = vector.shape_cast %147 : vector<8xf32> to vector<8x1xf32>
    %149 = vector.broadcast %148 : vector<8x1xf32> to vector<8x8xf32>
    %150 = arith.subf %146, %149 : vector<8x8xf32>
    %151 = math.exp %150 : vector<8x8xf32>
    %cst_52 = arith.constant dense<0.000000e+00> : vector<8xf32>
    %152 = vector.multi_reduction <add>, %151, %cst_52 [1] : vector<8x8xf32> to vector<8xf32>
    %153 = vector.shape_cast %152 : vector<8xf32> to vector<8x1xf32>
    %154 = tpu.reciprocal %153 : vector<8x1xf32> -> vector<8x1xf32>
    %155 = vector.broadcast %154 : vector<8x1xf32> to vector<8x8xf32>
    %156 = arith.mulf %151, %155 : vector<8x8xf32>
    %157 = vector.extract_strided_slice %108 {offsets = [0, 16], sizes = [8, 8], strides = [1, 1]} : vector<8x32xf32> to vector<8x8xf32>
    %cst_53 = arith.constant dense<0.000000e+00> : vector<8x8xf32>
    %158 = tpu.matmul %156, %157, %cst_53 {dimension_numbers = #tpu.dot_dimension_numbers<[1], [0], [0], [1], [0, 0, 1, 1], [], []>} : vector<8x8xf32>, vector<8x8xf32>, vector<8x8xf32> -> vector<8x8xf32>
    %159 = vector.extract_strided_slice %22 {offsets = [16, 0], sizes = [8, 32], strides = [1, 1]} : vector<32x32xf32> to vector<8x32xf32>
    %cst_54 = arith.constant dense<0.000000e+00> : vector<8x32xf32>
    %160 = tpu.matmul %158, %159, %cst_54 {dimension_numbers = #tpu.dot_dimension_numbers<[1], [0], [0], [1], [0, 0, 1, 1], [], []>} : vector<8x8xf32>, vector<8x32xf32>, vector<8x32xf32> -> vector<8x32xf32>
    %161 = arith.addf %143, %160 : vector<8x32xf32>
    %162 = vector.extract_strided_slice %104 {offsets = [0, 24], sizes = [8, 8], strides = [1, 1]} : vector<8x32xf32> to vector<8x8xf32>
    %163 = vector.extract_strided_slice %106 {offsets = [0, 24], sizes = [8, 8], strides = [1, 1]} : vector<8x32xf32> to vector<8x8xf32>
    %cst_55 = arith.constant dense<0.000000e+00> : vector<8x8xf32>
    %164 = tpu.matmul %162, %163, %cst_55 {dimension_numbers = #tpu.dot_dimension_numbers<[1], [1], [0], [0], [0, 0, 1, 0], [], []>} : vector<8x8xf32>, vector<8x8xf32>, vector<8x8xf32> -> vector<8x8xf32>
    %cst_56 = arith.constant dense<0xFF800000> : vector<8xf32>
    %165 = vector.multi_reduction <maximumf>, %164, %cst_56 [1] : vector<8x8xf32> to vector<8xf32>
    %166 = vector.shape_cast %165 : vector<8xf32> to vector<8x1xf32>
    %167 = vector.broadcast %166 : vector<8x1xf32> to vector<8x8xf32>
    %168 = arith.subf %164, %167 : vector<8x8xf32>
    %169 = math.exp %168 : vector<8x8xf32>
    %cst_57 = arith.constant dense<0.000000e+00> : vector<8xf32>
    %170 = vector.multi_reduction <add>, %169, %cst_57 [1] : vector<8x8xf32> to vector<8xf32>
    %171 = vector.shape_cast %170 : vector<8xf32> to vector<8x1xf32>
    %172 = tpu.reciprocal %171 : vector<8x1xf32> -> vector<8x1xf32>
    %173 = vector.broadcast %172 : vector<8x1xf32> to vector<8x8xf32>
    %174 = arith.mulf %169, %173 : vector<8x8xf32>
    %175 = vector.extract_strided_slice %108 {offsets = [0, 24], sizes = [8, 8], strides = [1, 1]} : vector<8x32xf32> to vector<8x8xf32>
    %cst_58 = arith.constant dense<0.000000e+00> : vector<8x8xf32>
    %176 = tpu.matmul %174, %175, %cst_58 {dimension_numbers = #tpu.dot_dimension_numbers<[1], [0], [0], [1], [0, 0, 1, 1], [], []>} : vector<8x8xf32>, vector<8x8xf32>, vector<8x8xf32> -> vector<8x8xf32>
    %177 = vector.extract_strided_slice %22 {offsets = [24, 0], sizes = [8, 32], strides = [1, 1]} : vector<32x32xf32> to vector<8x32xf32>
    %cst_59 = arith.constant dense<0.000000e+00> : vector<8x32xf32>
    %178 = tpu.matmul %176, %177, %cst_59 {dimension_numbers = #tpu.dot_dimension_numbers<[1], [0], [0], [1], [0, 0, 1, 1], [], []>} : vector<8x8xf32>, vector<8x32xf32>, vector<8x32xf32> -> vector<8x32xf32>
    %179 = arith.addf %161, %178 : vector<8x32xf32>
    %180 = vector.shape_cast %102 : vector<8x32xf32> to vector<8x1x32xf32>
    %181 = vector.shape_cast %179 : vector<8x32xf32> to vector<8x1x32xf32>
    %182 = tpu.concatenate %180, %181 in 1 : vector<8x1x32xf32>, vector<8x1x32xf32> -> vector<8x2x32xf32>
    %183 = vector.shape_cast %182 : vector<8x2x32xf32> to vector<16x32xf32>
    %184 = arith.addf %1, %183 : vector<16x32xf32>
    %185 = vector.broadcast %23 : vector<1x32xf32> to vector<16x32xf32>
    %186 = arith.addf %184, %185 : vector<16x32xf32>
    %cst_60 = arith.constant dense<0.000000e+00> : vector<16xf32>
    %187 = vector.multi_reduction <add>, %186, %cst_60 [1] : vector<16x32xf32> to vector<16xf32>
    %188 = vector.shape_cast %187 : vector<16xf32> to vector<16x1xf32>
    %cst_61 = arith.constant 3.200000e+01 : f32
    %189 = vector.broadcast %cst_61 : f32 to vector<16x1xf32>
    %190 = arith.divf %188, %189 : vector<16x1xf32>
    %191 = vector.broadcast %190 : vector<16x1xf32> to vector<16x32xf32>
    %192 = arith.subf %186, %191 : vector<16x32xf32>
    %193 = arith.mulf %192, %192 : vector<16x32xf32>
    %cst_62 = arith.constant dense<0.000000e+00> : vector<16xf32>
    %194 = vector.multi_reduction <add>, %193, %cst_62 [1] : vector<16x32xf32> to vector<16xf32>
    %195 = vector.shape_cast %194 : vector<16xf32> to vector<16x1xf32>
    %cst_63 = arith.constant 3.200000e+01 : f32
    %196 = vector.broadcast %cst_63 : f32 to vector<16x1xf32>
    %197 = arith.divf %195, %196 : vector<16x1xf32>
    %198 = vector.broadcast %190 : vector<16x1xf32> to vector<16x32xf32>
    %199 = arith.subf %186, %198 : vector<16x32xf32>
    %cst_64 = arith.constant 9.99999974E-6 : f32
    %200 = vector.broadcast %cst_64 : f32 to vector<16x1xf32>
    %201 = arith.addf %197, %200 : vector<16x1xf32>
    %202 = math.rsqrt %201 : vector<16x1xf32>
    %203 = vector.broadcast %202 : vector<16x1xf32> to vector<16x32xf32>
    %204 = arith.mulf %199, %203 : vector<16x32xf32>
    %205 = vector.broadcast %24 : vector<1x32xf32> to vector<16x32xf32>
    %206 = arith.mulf %204, %205 : vector<16x32xf32>
    %207 = vector.broadcast %25 : vector<1x32xf32> to vector<16x32xf32>
    %208 = arith.addf %206, %207 : vector<16x32xf32>
    %209 = vector.shape_cast %208 : vector<16x32xf32> to vector<8x1x2x32xf32>
    %c0_65 = arith.constant 0 : index
    %c0_66 = arith.constant 0 : index
    %c0_67 = arith.constant 0 : index
    %c0_68 = arith.constant 0 : index
    %210 = vector.load %arg5[%c0_65, %c0_66, %c0_67, %c0_68] : memref<8x1x2x32xf32, #tpu.memory_space<vmem>>, vector<8x1x2x32xf32>
    tpu.vector_store %arg5[%c0_65, %c0_66, %c0_67, %c0_68], %209 {strides = array<i32>} : memref<8x1x2x32xf32, #tpu.memory_space<vmem>>, vector<8x1x2x32xf32>,
    return
  }
  func.func @transform_0(%arg0: i32) -> (i32, i32, i32) {
    %c0_i32 = arith.constant 0 : i32
    %c0_i32_0 = arith.constant 0 : i32
    %c0_i32_1 = arith.constant 0 : i32
    return %c0_i32, %arg0, %c0_i32_0 : i32, i32, i32
  }
  func.func @transform_1(%arg0: i32) -> (i32, i32, i32) {
    %c0_i32 = arith.constant 0 : i32
    %c0_i32_0 = arith.constant 0 : i32
    %c0_i32_1 = arith.constant 0 : i32
    return %c0_i32, %arg0, %c0_i32_0 : i32, i32, i32
  }
  func.func @transform_2(%arg0: i32) -> (i32, i32, i32) {
    %c0_i32 = arith.constant 0 : i32
    %c0_i32_0 = arith.constant 0 : i32
    %c0_i32_1 = arith.constant 0 : i32
    %c0_i32_2 = arith.constant 0 : i32
    return %c0_i32, %c0_i32_0, %c0_i32_1 : i32, i32, i32
  }
  func.func @transform_3(%arg0: i32) -> (i32, i32) {
    %c0_i32 = arith.constant 0 : i32
    %c0_i32_0 = arith.constant 0 : i32
    %c0_i32_1 = arith.constant 0 : i32
    return %c0_i32, %c0_i32_0 : i32, i32
  }
  func.func @transform_4(%arg0: i32) -> (i32, i32, i32, i32) {
    %c0_i32 = arith.constant 0 : i32
    %c0_i32_0 = arith.constant 0 : i32
    %c0_i32_1 = arith.constant 0 : i32
    %c0_i32_2 = arith.constant 0 : i32
    return %c0_i32, %arg0, %c0_i32_0, %c0_i32_1 : i32, i32, i32, i32
  }
}

</mosaic_0001>

<bundles_post_ra>
// kernel: _self_attention_layer_impl.1
= control target key start
LH: loop header
LB: loop body
LE: loop exit
PB: predicated region body
PF: predicated region fallthrough
CT: control target
= control target key end

     0   :  { %9 = vsyncpa [#allocation3], 0  ;;  %s1954_s0 = inlined_call_operand.hbm [shape: f32[8,2,32], index: 0, kind: input, shape index: {}]   ;;  %s1955_s1 = inlined_call_operand.hbm [shape: f32[8,2,32], index: 1, kind: input, shape index: {}]   ;;  %s1956_s2 = inlined_call_operand.hbm [shape: f32[3,32,128], index: 2, kind: input, shape index: {}]   ;;  %s1957_s3 = inlined_call_operand.hbm [shape: f32[8,128], index: 3, kind: input, shape index: {}]   ;;  %s1958_s4 = inlined_call_operand.hbm [shape: f32[8,1,2,32], index: 4, kind: output, shape index: {}]  }
   0x1   :  { %10 = vsyncpa [#allocation6], 0 }
   0x2   :  { %11 = vsyncpa [#allocation9], 0 }
   0x3   :  { %12 = vsyncpa [#allocation4], 0  ;;  %s30_s17 = sshll.u32 %s1955_s1, 4  ;;  %s1647_s18 = smov [#allocation5]   ;;  %s31_s17 = int_to_ptr.hbm [resolvable:$true] %s30_s17 }
   0x4   :  { %s32_s19 = sshll.u32 %s1647_s18, 4  ;;  %s17_s22 = sshll.u32 %s1954_s0, 4  ;;  %s33_s19 = int_to_ptr.vmem [resolvable:$true] %s32_s19  ;;  %s18_s22 = int_to_ptr.hbm [resolvable:$true] %s17_s22 }
   0x5   :  { %s1648_s23 = smov 32   ;;  %s1649_s24 = smov 2  }
   0x6   :  { %38 = dma.hbm_to_vmem [thread:$0]  %s31_s17, 256, %s33_s19, [#allocation6], %s1648_s23, %s1648_s23, %s1649_s24  }
   0x7   :  { %s1650_s25 = smov [#allocation2]   ;;  %s43_s1 = sshll.u32 %s1956_s2, 4  ;;  %s44_s1 = int_to_ptr.hbm [resolvable:$true] %s43_s1 }
   0x8   :  { %s19_s26 = sshll.u32 %s1650_s25, 4  ;;  %s1651_s0 = smov [#allocation7]   ;;  %s20_s26 = int_to_ptr.vmem [resolvable:$true] %s19_s26 }
   0x9   :  { %25 = dma.hbm_to_vmem [thread:$0]  %s18_s22, 256, %s20_s26, [#allocation3], %s1648_s23, %s1648_s23, %s1649_s24  }
   0xa   :  { %s45_s29 = sshll.u32 %s1651_s0, 4  ;;  %s57_s6 = sshll.u32 %s1957_s3, 4  ;;  %s46_s29 = int_to_ptr.vmem [resolvable:$true] %s45_s29  ;;  %s58_s6 = int_to_ptr.hbm [resolvable:$true] %s57_s6 }
   0xb   :  { %s1652_s7 = smov 128   ;;  %s1653_s8 = smov 8  }
   0xc   :  { %51 = dma.hbm_to_vmem [thread:$0]  %s44_s1, 1536, %s46_s29, [#allocation6], %s1652_s7, %s1652_s7, %s1653_s8  }
   0xd   :  { %s1654_s9 = smov [#allocation8]  }
   0xe   :  { %s59_s10 = sshll.u32 %s1654_s9, 4  ;;  %s60_s10 = int_to_ptr.vmem [resolvable:$true] %s59_s10 }
   0xf   :  { %62 = dma.hbm_to_vmem [thread:$0]  %s58_s6, 128, %s60_s10, [#allocation9]  }
  0x10   :  { %1639 = dma.done.wait [#allocation3], 256  }
  0x11   :  { %1640 = vsyncadd [#allocation3], 4294967040 }
  0x12   :  { %1641 = dma.done.wait [#allocation6], 1792  }
  0x13   :  { %1642 = vsyncadd [#allocation6], 4294965504 }
  0x14   :  { %1643 = dma.done.wait [#allocation9], 128  }
  0x15   :  { %1644 = vsyncadd [#allocation9], 4294967168  ;;  %v103_v0 = vld [vmem:[#allocation7 + $0x38] sm:$0xff]  ;;  %v102_v2 = vld [vmem:[#allocation7 + $0x30] sm:$0xff]  ;;  %vm129_vm0 = vcmask 261120   ;;  %vm237_vm1 = vcmask 1041409  }
  0x16   :  { %v98_v1 = vld [vmem:[#allocation7 + $0x18] sm:$0xff]  ;;  %146 = vmatpush.msra.mxu0 %v103_v0  ;;  %v97_v3 = vld [vmem:[#allocation7 + $0x10] sm:$0xff]  ;;  %v101_v4 = vld [vmem:[#allocation7 + $0x28] sm:$0xff]  ;;  %vm239_vm2 = vcmask 1042434   ;;  %vm241_vm3 = vcmask 1043459   ;;  %vm243_vm4 = vcmask 1044484  }
  0x17   :  { %198 = vmatpush.msra.mxu1 %v98_v1  ;;  %v96_v5 = vld [vmem:[#allocation7 + $0x8] sm:$0xff]  ;;  %v87_v6 = vld [vmem:[#allocation5] sm:$0x3]  ;;  %v88_v7 = vld [vmem:[#allocation5 + $0x2] sm:$0x3]  ;;  %vm245_vm5 = vcmask 1045509  }
  0x18   :  { %147 = vmatpush.msra.mxu0 %v102_v2  ;;  %v89_v8 = vld [vmem:[#allocation5 + $0x4] sm:$0x3]  ;;  %v100_v9 = vld [vmem:[#allocation7 + $0x20] sm:$0xff]  ;;  %v90_v11 = vld [vmem:[#allocation5 + $0x6] sm:$0x3]  ;;  %vm247_vm6 = vcmask 1046534  }
  0x19   :  { %199 = vmatpush.msra.mxu1 %v97_v3  ;;  %v95_v10 = vld [vmem:[#allocation7] sm:$0xff]  ;;  %112 = vst [vmem:[#allocation1] ss:$4 sm:$0xff] %v87_v6  ;;  %v91_v12 = vld [vmem:[#allocation5 + $0x8] sm:$0x3]  ;;  %vm249_vm7 = vcmask 1047559  }
  0x1a   :  { %148 = vmatpush.msra.mxu0 %v101_v4  ;;  %114 = vst [vmem:[#allocation1 + $0x1] ss:$4 sm:$0xff] %v88_v7  ;;  %v92_v13 = vld [vmem:[#allocation5 + $0xa] sm:$0x3]  ;;  %v93_v14 = vld [vmem:[#allocation5 + $0xc] sm:$0x3] }
  0x1b   :  { %200 = vmatpush.msra.mxu1 %v96_v5  ;;  %116 = vst [vmem:[#allocation1 + $0x2] ss:$4 sm:$0xff] %v89_v8  ;;  %v94_v15 = vld [vmem:[#allocation5 + $0xe] sm:$0x3]  ;;  %v1715_v16 = vld [vmem:[#allocation2] sm:$0x3] }
  0x1c   :  { %149 = vmatpush.msra.mxu0 %v100_v9  ;;  %118 = vst [vmem:[#allocation1 + $0x3] ss:$4 sm:$0xff] %v90_v11  ;;  %v1717_v17 = vld [vmem:[#allocation2 + $0x2] sm:$0x3]  ;;  %v1719_v19 = vld [vmem:[#allocation2 + $0x4] sm:$0x3] }
  0x1d   :  { %201 = vmatpush.msra.mxu1 %v95_v10  ;;  %120 = vst [vmem:[#allocation1 + $0x20] ss:$4 sm:$0xff] %v91_v12  ;;  %v1722_v20 = vld [vmem:[#allocation2 + $0x6] sm:$0x3]  ;;  %v1726_v21 = vld [vmem:[#allocation2 + $0x8] sm:$0x3] }
  0x1e   :  { %122 = vst [vmem:[#allocation1 + $0x21] ss:$4 sm:$0xff] %v92_v13  ;;  %v1729_v22 = vld [vmem:[#allocation2 + $0xa] sm:$0x3]  ;;  %v1731_v23 = vld [vmem:[#allocation2 + $0xc] sm:$0x3] }
  0x1f   :  { %124 = vst [vmem:[#allocation1 + $0x22] ss:$4 sm:$0xff] %v93_v14  ;;  %v1734_v25 = vld [vmem:[#allocation2 + $0xe] sm:$0x3]  ;;  %v1477_v29 = vld [vmem:[#allocation8] ss:$0 sm:$0xff] }
  0x20   :  { %126 = vst [vmem:[#allocation1 + $0x23] ss:$4 sm:$0xff] %v94_v15  ;;  %s1655_s2 = smov 88   ;;  %s1656_s3 = smov 96   ;;  %vm253_vm8 = vcmask 64512  }
  0x21   :  { %s1657_s11 = smov 120   ;;  %s1658_s12 = smov 80  }
  0x22   :  { %s1659_s13 = smov 112   ;;  %s1660_s14 = smov 64  }
  0x23   :  { %v127_v18 = vld.sshfl [vmem:[#allocation1] sm:$0xff pattern:$0x73625140]  ;;  %s1661_s15 = smov 48   ;;  %s1662_s16 = smov 56  }
  0x24   :  { %1416 = vmatmul.msk.f32.vlgmr.msra.gmra.mxu0 %vm129_vm0, %v127_v18  ;;  %165 = vst [vmem:[#allocation1] ss:$4 sm:$0xff] %v1715_v16  ;;  %s1663_s17 = smov 72   ;;  %s1664_s18 = smov 104  }
  0x25   :  { %167 = vst [vmem:[#allocation1 + $0x1] ss:$4 sm:$0xff] %v1717_v17  ;;  %s1665_s19 = smov 40   ;;  %s1671_s20 = smov [#allocation10]  }
  0x26   :  { %169 = vst [vmem:[#allocation1 + $0x2] ss:$4 sm:$0xff] %v1719_v19  ;;  %s1399_s21 = sshll.u32 %s1671_s20, 4  ;;  %s1401_s26 = sshll.u32 %s1958_s4, 4  ;;  %s1400_s21 = int_to_ptr.vmem [resolvable:$true] %s1399_s21  ;;  %s1402_s26 = int_to_ptr.hbm [resolvable:$true] %s1401_s26 }
  0x27   :  { %171 = vst [vmem:[#allocation1 + $0x3] ss:$4 sm:$0xff] %v1722_v20  ;;  %v128_v24 = vld.sshfl [vmem:[#allocation1 + $0x20] sm:$0xff pattern:$0x73625140] }
  0x28   :  { %173 = vst [vmem:[#allocation1 + $0x20] ss:$4 sm:$0xff] %v1726_v21 }
  0x29   :  { %175 = vst [vmem:[#allocation1 + $0x21] ss:$4 sm:$0xff] %v1729_v22 }
  0x2a   :  { %177 = vst [vmem:[#allocation1 + $0x22] ss:$4 sm:$0xff] %v1731_v23 }
  0x2b   :  { %179 = vst [vmem:[#allocation1 + $0x23] ss:$4 sm:$0xff] %v1734_v25 }
  0x2c   :  { %1417 = vmatmul.msk.f32.gmra.mxu0 %vm129_vm0, %v128_v24 }
  0x2e   :  { %v180_v26 = vld.sshfl [vmem:[#allocation1] sm:$0xff pattern:$0x73625140] }
  0x2f   :  { %1418 = vmatmul.msk.f32.vlgmr.msra.gmra.mxu1 %vm129_vm0, %v180_v26 }
  0x32   :  { %v181_v27 = vld.sshfl [vmem:[#allocation1 + $0x20] sm:$0xff pattern:$0x73625140] }
  0x37   :  { %1419 = vmatmul.msk.f32.gmra.mxu1 %vm129_vm0, %v181_v27 }
  0xa1   :  { %v151_v28 = vpop.f32.mrf.mxu0 }
  0xa9   :  { %v154_v37 = vpop.f32.mrf.mxu0 }
  0xac   :  { %v203_v30 = vpop.f32.mrf.mxu1 }
  0xad   :  { %v204_v31 = vadd.f32 %v203_v30, %v151_v28 }
  0xaf   :  { %v211_v32 = vadd.f32 %v1477_v29, %v204_v31 }
  0xb1   :  { %v215_v33 = vrot.slane %v211_v32, 2  ;;  %v216_v34 = vrot.slane %v211_v32, 4  ;;  %v217_v35 = vrot.slane %v211_v32, 6  ;;  %v229_v36 = vperm.slane %v211_v32, 0 }
  0xb2   :  { %v656_v40 = vperm.slane %v211_v32, 1 }
  0xb3   :  { %v230_v38 = vperm.slane %v215_v33, 0  ;;  %v231_v39 = vperm.slane %v216_v34, 0  ;;  %v657_v41 = vperm.slane %v215_v33, 1  ;;  %v658_v42 = vperm.slane %v216_v34, 1 }
  0xb4   :  { %v206_v43 = vpop.f32.mrf.mxu1  ;;  %v659_v45 = vperm.slane %v217_v35, 1  ;;  %v232_v52 = vperm.slane %v217_v35, 0 }
  0xb5   :  { %v238_v44 = vsel %vm237_vm1, %v230_v38, %v229_v36  ;;  %v664_v46 = vsel %vm237_vm1, %v657_v41, %v656_v40  ;;  %v207_v47 = vadd.f32 %v206_v43, %v154_v37 }
  0xb6   :  { %v665_v48 = vsel %vm239_vm2, %v658_v42, %v664_v46  ;;  %v240_v49 = vsel %vm239_vm2, %v231_v39, %v238_v44 }
  0xb7   :  { %v666_v50 = vsel %vm241_vm3, %v659_v45, %v665_v48  ;;  %v212_v51 = vadd.f32 %v1477_v29, %v207_v47  ;;  %v242_v57 = vsel %vm241_vm3, %v232_v52, %v240_v49 }
  0xb9   :  { %v218_v53 = vrot.slane %v212_v51, 2  ;;  %v219_v54 = vrot.slane %v212_v51, 4  ;;  %v220_v55 = vrot.slane %v212_v51, 6  ;;  %v233_v56 = vperm.slane %v212_v51, 0 }
  0xba   :  { %v660_v58 = vperm.slane %v212_v51, 1 }
  0xbb   :  { %v234_v59 = vperm.slane %v218_v53, 0  ;;  %v235_v60 = vperm.slane %v219_v54, 0  ;;  %v244_v61 = vsel %vm243_vm4, %v233_v56, %v242_v57  ;;  %v661_v62 = vperm.slane %v218_v53, 1 }
  0xbc   :  { %v662_v63 = vperm.slane %v219_v54, 1  ;;  %v667_v0 = vsel %vm243_vm4, %v660_v58, %v666_v50  ;;  %v236_v1 = vperm.slane %v220_v55, 0  ;;  %v663_v4 = vperm.slane %v220_v55, 1 }
  0xbd   :  { %v246_v2 = vsel %vm245_vm5, %v234_v59, %v244_v61  ;;  %v668_v5 = vsel %vm245_vm5, %v661_v62, %v667_v0 }
  0xbe   :  { %v248_v3 = vsel %vm247_vm6, %v235_v60, %v246_v2  ;;  %v669_v7 = vsel %vm247_vm6, %v662_v63, %v668_v5 }
  0xbf   :  { %v1745_v6 = vsel %vm249_vm7, %v236_v1, %v248_v3  ;;  %v1747_v8 = vsel %vm249_vm7, %v663_v4, %v669_v7 }
  0xc0   :  { %330 = vrot.lane.b32.xlu2 %v1745_v6, %s1655_s2  ;;  %251 = vrot.lane.b32.xlu0 %v1745_v6, %s1656_s3 }
  0xc8   :  { %328 = vrot.lane.b32.xlu2 %v1745_v6, %s1657_s11 }
  0xd0   :  { %454 = vrot.lane.b32.xlu2 %v1745_v6, %s1658_s12 }
  0xd8   :  { %452 = vrot.lane.b32.xlu2 %v1745_v6, %s1659_s13 }
 0x11a   :  { %v331_v9 = vpop.permute.xlu2 %330 }
 0x122   :  { %v329_v10 = vpop.permute.xlu2 %328 }
 0x12a   :  { %v455_v11 = vpop.permute.xlu2 %454 }
 0x12b   :  { %1428 = vmatpush.xpose.msk.msrb.mxu0 %vm253_vm8, %v455_v11 }
 0x132   :  { %v453_v12 = vpop.permute.xlu2 %452  ;;  %v252_v13 = vpop.permute.xlu0 %251 }
 0x133   :  { %1420 = vmatpush.xpose.msk.msra.mxu2 %vm253_vm8, %v252_v13  ;;  %1429 = vmatmul.msk.f32.vlgmr.msrb.gmra.mxu0 %vm253_vm8, %v453_v12 }
 0x136   :  { %1421 = vmatmul.msk.f32.vlgmr.msra.gmra.mxu2 %vm253_vm8, %v1745_v6 }
 0x1b0   :  { %v477_v29 = vpop.f32.mrf.mxu0 }
 0x1b1   :  { %v480_v30 = vsel %vm253_vm8, %v477_v29, -inf }
 0x1b9   :  { %v275_v14 = vpop.f32.mrf.mxu2 }
 0x1ba   :  { %v278_v15 = vsel %vm253_vm8, %v275_v14, -inf }
 0x1bb   :  { %279 = vmax.xlane.f32.xlu0 %v278_v15  ;;  %v223_v15 = vld [vmem:[#allocation7 + $0x48] sm:$0xff] }
 0x22e   :  { %v280_v18 = vpop.xlane.xlu0 %279 }
 0x22f   :  { %v281_v24 = vsub.f32 %v275_v14, %v280_v18 }
 0x231   :  { %v282_v26 = vmul.f32 1.442695, %v281_v24 }
 0x233   :  { %1481 = vpow2.f32 %v282_v26 }
 0x239   :  { %v1482_v27 = vpop.eup %1481 }
 0x23a   :  { %v284_v28 = vsel %vm253_vm8, %v1482_v27, 0.0 }
 0x23b   :  { %285 = vadd.xlane.f32.xlu1 %v284_v28 }
 0x254   :  { %302 = vrot.lane.b32.xlu1 %v1745_v6, %s1660_s14 }
 0x27e   :  { %481 = vmax.xlane.f32.xlu1 %v480_v30  ;;  %v222_v30 = vld [vmem:[#allocation7 + $0x40] sm:$0xff] }
 0x297   :  { %671 = vrot.lane.b32.xlu1 %v1747_v8, %s1656_s3 }
 0x2ae   :  { %v286_v31 = vpop.xlane.xlu1 %285 }
 0x2af   :  { %1483 = vrcp.f32 %v286_v31  ;;  %v298_v37 = vand.u32 2147483648, %v286_v31  ;;  %vm292_vm10 = vweird.f32 %v286_v31  ;;  %v296_v38 = vand.u32 2147483647, %v286_v31 }
 0x2b1   :  { %v299_v40 = vor.u32 1.1754944e-38, %v298_v37  ;;  %vm297_vm12 = vcmp.eq.f32.partialorder %v296_v38, 8.507059e+37 }
 0x2b5   :  { %v1484_v32 = vpop.eup %1483 }
 0x2b6   :  { %v288_v33 = vmul.f32 %v1484_v32, %v286_v31  ;;  %vm293_vm9 = vweird.f32 %v1484_v32 }
 0x2b7   :  { %vm294_vm11 = vmor %vm292_vm10, %vm293_vm9 }
 0x2b8   :  { %v289_v34 = vsub.f32 1.0, %v288_v33 }
 0x2ba   :  { %v290_v35 = vmul.f32 %v1484_v32, %v289_v34  ;;  %v224_v34 = vld [vmem:[#allocation7 + $0x50] sm:$0xff] }
 0x2bc   :  { %v291_v36 = vadd.f32 %v1484_v32, %v290_v35 }
 0x2be   :  { %v295_v39 = vsel %vm294_vm11, %v1484_v32, %v291_v36 }
 0x2bf   :  { %v300_v41 = vsel %vm297_vm12, %v299_v40, %v295_v39 }
 0x2c0   :  { %v301_v43 = vmul.f32 %v1482_v27, %v300_v41 }
 0x2c6   :  { %v303_v42 = vpop.permute.xlu1 %302 }
 0x2c7   :  { %323 = vmatpush.msra.mxu3 %v303_v42 }
 0x2c8   :  { %1422 = vmatmul.msk.f32.vlgmr.msra.gmra.mxu3 %vm253_vm8, %v301_v43 }
 0x2c9   :  { %1423 = vmatpush.xpose.msk.msrb.mxu3 %vm253_vm8, %v331_v9 }
 0x2cd   :  { %424 = vmatpush.msra.mxu3 %v223_v15 }
 0x2d0   :  { %1424 = vmatmul.msk.f32.vlgmr.msrb.gmra.mxu3 %vm253_vm8, %v329_v10 }
 0x2d1   :  { %548 = vmatpush.msrb.mxu3 %v224_v34 }
 0x2f1   :  { %v482_v44 = vpop.xlane.xlu1 %481 }
 0x2f2   :  { %v483_v45 = vsub.f32 %v477_v29, %v482_v44 }
 0x2f4   :  { %v484_v46 = vmul.f32 1.442695, %v483_v45 }
 0x2f6   :  { %1485 = vpow2.f32 %v484_v46 }
 0x2fc   :  { %v1486_v47 = vpop.eup %1485 }
 0x2fd   :  { %v486_v48 = vsel %vm253_vm8, %v1486_v47, 0.0 }
 0x2fe   :  { %487 = vadd.xlane.f32.xlu0 %v486_v48 }
 0x309   :  { %v672_v36 = vpop.permute.xlu1 %671 }
 0x34b   :  { %v1775_v49 = vpop.f32.mrf.mxu3 }
 0x353   :  { %v353_v50 = vpop.f32.mrf.mxu3 }
 0x354   :  { %v356_v51 = vsel %vm253_vm8, %v353_v50, -inf }
 0x355   :  { %357 = vmax.xlane.f32.xlu2 %v356_v51 }
 0x36d   :  { %504 = vrot.lane.b32.xlu2 %v1745_v6, %s1661_s15 }
 0x371   :  { %v488_v52 = vpop.xlane.xlu0 %487 }
 0x372   :  { %1487 = vrcp.f32 %v488_v52  ;;  %v500_v58 = vand.u32 2147483648, %v488_v52  ;;  %vm494_vm14 = vweird.f32 %v488_v52  ;;  %v498_v59 = vand.u32 2147483647, %v488_v52 }
 0x374   :  { %v501_v63 = vor.u32 1.1754944e-38, %v500_v58  ;;  %vm499_vm1 = vcmp.eq.f32.partialorder %v498_v59, 8.507059e+37 }
 0x378   :  { %v1488_v53 = vpop.eup %1487 }
 0x379   :  { %v490_v54 = vmul.f32 %v1488_v53, %v488_v52  ;;  %vm495_vm13 = vweird.f32 %v1488_v53 }
 0x37a   :  { %vm496_vm15 = vmor %vm494_vm14, %vm495_vm13 }
 0x37b   :  { %v491_v55 = vsub.f32 1.0, %v490_v54 }
 0x37d   :  { %v492_v56 = vmul.f32 %v1488_v53, %v491_v55 }
 0x37f   :  { %v493_v57 = vadd.f32 %v1488_v53, %v492_v56 }
 0x381   :  { %v497_v62 = vsel %vm496_vm15, %v1488_v53, %v493_v57 }
 0x382   :  { %v502_v1 = vsel %vm499_vm1, %v501_v63, %v497_v62 }
 0x383   :  { %v503_v3 = vmul.f32 %v1486_v47, %v502_v1 }
 0x3c8   :  { %v358_v60 = vpop.xlane.xlu2 %357 }
 0x3c9   :  { %v359_v61 = vsub.f32 %v353_v50, %v358_v60 }
 0x3cb   :  { %v360_v0 = vmul.f32 1.442695, %v359_v61 }
 0x3cd   :  { %1489 = vpow2.f32 %v360_v0 }
 0x3d0   :  { %v505_v2 = vpop.permute.xlu2 %504 }
 0x3d1   :  { %525 = vmatpush.msrb.mxu1 %v505_v2 }
 0x3d2   :  { %1430 = vmatmul.msk.f32.vlgmr.msrb.gmra.mxu1 %vm253_vm8, %v503_v3 }
 0x3d3   :  { %v1490_v4 = vpop.eup %1489 }
 0x3d4   :  { %v362_v5 = vsel %vm253_vm8, %v1490_v4, 0.0 }
 0x3d5   :  { %363 = vadd.xlane.f32.xlu0 %v362_v5 }
 0x3e9   :  { %380 = vrot.lane.b32.xlu0 %v1745_v6, %s1662_s16 }
 0x3f1   :  { %556 = vrot.lane.b32.xlu0 %v1745_v6, %s1663_s17 }
 0x3f9   :  { %554 = vrot.lane.b32.xlu0 %v1745_v6, %s1664_s18 }
 0x401   :  { %721 = vrot.lane.b32.xlu0 %v1747_v8, %s1660_s14 }
 0x448   :  { %v364_v7 = vpop.xlane.xlu0 %363 }
 0x449   :  { %1491 = vrcp.f32 %v364_v7  ;;  %v376_v12 = vand.u32 2147483648, %v364_v7  ;;  %v374_v14 = vand.u32 2147483647, %v364_v7  ;;  %vm370_vm3 = vweird.f32 %v364_v7 }
 0x44b   :  { %v377_v24 = vor.u32 1.1754944e-38, %v376_v12  ;;  %vm375_vm5 = vcmp.eq.f32.partialorder %v374_v14, 8.507059e+37 }
 0x44f   :  { %v1492_v9 = vpop.eup %1491  ;;  %v527_v37 = vpop.f32.mrf.mxu1 }
 0x450   :  { %v366_v10 = vmul.f32 %v1492_v9, %v364_v7  ;;  %vm371_vm2 = vweird.f32 %v1492_v9 }
 0x451   :  { %vm372_vm4 = vmor %vm370_vm3, %vm371_vm2 }
 0x452   :  { %v367_v11 = vsub.f32 1.0, %v366_v10 }
 0x454   :  { %v368_v13 = vmul.f32 %v1492_v9, %v367_v11 }
 0x456   :  { %v369_v18 = vadd.f32 %v1492_v9, %v368_v13 }
 0x458   :  { %v373_v26 = vsel %vm372_vm4, %v1492_v9, %v369_v18 }
 0x459   :  { %v378_v27 = vsel %vm375_vm5, %v377_v24, %v373_v26 }
 0x45a   :  { %v379_v28 = vmul.f32 %v1490_v4, %v378_v27 }
 0x45b   :  { %v381_v29 = vpop.permute.xlu0 %380 }
 0x45c   :  { %401 = vmatpush.msrb.mxu2 %v381_v29 }
 0x45d   :  { %1425 = vmatmul.msk.f32.vlgmr.msrb.gmra.mxu2 %vm253_vm8, %v379_v28 }
 0x45e   :  { %447 = vmatpush.msra.mxu2 %v222_v30 }
 0x463   :  { %v557_v31 = vpop.permute.xlu0 %556 }
 0x464   :  { %1432 = vmatpush.xpose.msk.msrb.mxu2 %vm253_vm8, %v557_v31 }
 0x465   :  { %1427 = vmatmul.msk.f32.vlgmr.msra.gmra.mxu2 %vm253_vm8, %v1775_v49 }
 0x46b   :  { %v555_v32 = vpop.permute.xlu0 %554 }
 0x46d   :  { %1433 = vmatmul.msk.f32.vlgmr.msrb.gmra.mxu2 %vm253_vm8, %v555_v32  ;;  %v1827_v32 = vld [vmem:[#allocation7 + $0x58] sm:$0xff] }
 0x46e   :  { %650 = vmatpush.msra.mxu1 %v1827_v32 }
 0x473   :  { %v722_v33 = vpop.permute.xlu0 %721 }
 0x474   :  { %742 = vmatpush.msra.mxu2 %v722_v33 }
 0x476   :  { %866 = vmatpush.msrb.mxu2 %v222_v30 }
 0x4e0   :  { %v403_v35 = vpop.f32.mrf.mxu2 }
 0x4e1   :  { %1426 = vmatmul.msk.f32.vlgmr.msra.gmra.mxu3 %vm253_vm8, %v403_v35 }
 0x4e2   :  { %1436 = vmatpush.xpose.msk.msra.mxu3 %vm253_vm8, %v672_v36 }
 0x4e8   :  { %v449_v38 = vpop.f32.mrf.mxu2 }
 0x4e9   :  { %1431 = vmatmul.msk.f32.vlgmr.msrb.gmra.mxu3 %vm253_vm8, %v527_v37 }
 0x4ea   :  { %843 = vmatpush.msrb.mxu3 %v223_v15 }
 0x4f0   :  { %v579_v39 = vpop.f32.mrf.mxu2 }
 0x4f1   :  { %1437 = vmatmul.msk.f32.vlgmr.msra.gmra.mxu3 %vm253_vm8, %v1747_v8  ;;  %v582_v40 = vsel %vm253_vm8, %v579_v39, -inf }
 0x4f2   :  { %583 = vmax.xlane.f32.xlu0 %v582_v40  ;;  %967 = vmatpush.msra.mxu3 %v224_v34 }
 0x506   :  { %747 = vrot.lane.b32.xlu0 %v1747_v8, %s1657_s11 }
 0x50e   :  { %871 = vrot.lane.b32.xlu0 %v1747_v8, %s1659_s13 }
 0x564   :  { %v426_v41 = vpop.f32.mrf.mxu3 }
 0x565   :  { %v584_v42 = vpop.xlane.xlu0 %583  ;;  %v450_v43 = vadd.f32 %v449_v38, %v426_v41 }
 0x566   :  { %v585_v44 = vsub.f32 %v579_v39, %v584_v42 }
 0x568   :  { %v586_v47 = vmul.f32 1.442695, %v585_v44 }
 0x56a   :  { %1493 = vpow2.f32 %v586_v47 }
 0x56c   :  { %v550_v45 = vpop.f32.mrf.mxu3 }
 0x56d   :  { %v1805_v46 = vadd.f32 %v550_v45, %v450_v43 }
 0x570   :  { %v1494_v50 = vpop.eup %1493 }
 0x571   :  { %v588_v51 = vsel %vm253_vm8, %v1494_v50, 0.0 }
 0x574   :  { %v694_v48 = vpop.f32.mrf.mxu3 }
 0x575   :  { %v697_v49 = vsel %vm253_vm8, %v694_v48, -inf }
 0x576   :  { %698 = vmax.xlane.f32.xlu2 %v697_v49 }
 0x578   :  { %v748_v29 = vpop.permute.xlu0 %747 }
 0x57e   :  { %589 = vadd.xlane.f32.xlu2 %v588_v51 }
 0x580   :  { %v872_v31 = vpop.permute.xlu0 %871 }
 0x596   :  { %749 = vrot.lane.b32.xlu2 %v1747_v8, %s1655_s2 }
 0x59e   :  { %975 = vrot.lane.b32.xlu2 %v1747_v8, %s1663_s17 }
 0x5e9   :  { %v699_v52 = vpop.xlane.xlu2 %698 }
 0x5ea   :  { %v700_v53 = vsub.f32 %v694_v48, %v699_v52 }
 0x5ec   :  { %v701_v54 = vmul.f32 1.442695, %v700_v53 }
 0x5ee   :  { %1495 = vpow2.f32 %v701_v54 }
 0x5f1   :  { %v590_v57 = vpop.xlane.xlu2 %589 }
 0x5f2   :  { %1497 = vrcp.f32 %v590_v57  ;;  %v602_v9 = vand.u32 2147483648, %v590_v57  ;;  %vm596_vm11 = vweird.f32 %v590_v57  ;;  %v600_v11 = vand.u32 2147483647, %v590_v57 }
 0x5f4   :  { %v1496_v55 = vpop.eup %1495  ;;  %v603_v18 = vor.u32 1.1754944e-38, %v602_v9  ;;  %vm601_vm14 = vcmp.eq.f32.partialorder %v600_v11, 8.507059e+37 }
 0x5f5   :  { %v703_v56 = vsel %vm253_vm8, %v1496_v55, 0.0 }
 0x5f6   :  { %704 = vadd.xlane.f32.xlu1 %v703_v56 }
 0x5f8   :  { %v1498_v58 = vpop.eup %1497 }
 0x5f9   :  { %v592_v60 = vmul.f32 %v1498_v58, %v590_v57  ;;  %v750_v1 = vpop.permute.xlu2 %749  ;;  %vm597_vm7 = vweird.f32 %v1498_v58 }
 0x5fa   :  { %vm598_vm13 = vmor %vm596_vm11, %vm597_vm7 }
 0x5fb   :  { %v593_v61 = vsub.f32 1.0, %v592_v60 }
 0x5fd   :  { %v594_v0 = vmul.f32 %v1498_v58, %v593_v61 }
 0x5ff   :  { %v595_v5 = vadd.f32 %v1498_v58, %v594_v0 }
 0x601   :  { %v599_v14 = vsel %vm598_vm13, %v1498_v58, %v595_v5  ;;  %v976_v24 = vpop.permute.xlu2 %975  ;;  %vm1114_vm13 = vcmask 1040384  }
 0x602   :  { %v604_v26 = vsel %vm601_vm14, %v603_v18, %v599_v14 }
 0x603   :  { %v605_v28 = vmul.f32 %v1494_v50, %v604_v26 }
 0x60f   :  { %606 = vrot.lane.b32.xlu1 %v1745_v6, %s1665_s19 }
 0x617   :  { %873 = vrot.lane.b32.xlu1 %v1747_v8, %s1658_s12 }
 0x61f   :  { %973 = vrot.lane.b32.xlu1 %v1747_v8, %s1664_s18 }
 0x669   :  { %v705_v59 = vpop.xlane.xlu1 %704 }
 0x66a   :  { %1499 = vrcp.f32 %v705_v59  ;;  %v717_v3 = vand.u32 2147483648, %v705_v59  ;;  %v715_v4 = vand.u32 2147483647, %v705_v59  ;;  %vm711_vm9 = vweird.f32 %v705_v59 }
 0x66c   :  { %v718_v10 = vor.u32 1.1754944e-38, %v717_v3  ;;  %vm716_vm12 = vcmp.eq.f32.partialorder %v715_v4, 8.507059e+37 }
 0x670   :  { %v1500_v62 = vpop.eup %1499 }
 0x671   :  { %v707_v63 = vmul.f32 %v1500_v62, %v705_v59  ;;  %vm712_vm6 = vweird.f32 %v1500_v62 }
 0x672   :  { %vm713_vm10 = vmor %vm711_vm9, %vm712_vm6 }
 0x673   :  { %v708_v2 = vsub.f32 1.0, %v707_v63 }
 0x675   :  { %v709_v6 = vmul.f32 %v1500_v62, %v708_v2 }
 0x677   :  { %v710_v7 = vadd.f32 %v1500_v62, %v709_v6 }
 0x679   :  { %v714_v12 = vsel %vm713_vm10, %v1500_v62, %v710_v7 }
 0x67a   :  { %v719_v13 = vsel %vm716_vm12, %v718_v10, %v714_v12 }
 0x67b   :  { %v720_v15 = vmul.f32 %v1496_v55, %v719_v13 }
 0x67d   :  { %1438 = vmatmul.msk.f32.vlgmr.msra.gmra.mxu2 %vm253_vm8, %v720_v15 }
 0x67e   :  { %1448 = vmatpush.xpose.msk.msra.mxu2 %vm253_vm8, %v976_v24 }
 0x681   :  { %v607_v27 = vpop.permute.xlu1 %606 }
 0x682   :  { %627 = vmatpush.msra.mxu0 %v607_v27 }
 0x683   :  { %1434 = vmatmul.msk.f32.vlgmr.msra.gmra.mxu0 %vm253_vm8, %v605_v28 }
 0x684   :  { %1439 = vmatpush.xpose.msk.msrb.mxu0 %vm253_vm8, %v750_v1 }
 0x689   :  { %v874_v30 = vpop.permute.xlu1 %873 }
 0x68a   :  { %1444 = vmatpush.xpose.msk.msra.mxu0 %vm253_vm8, %v874_v30 }
 0x68b   :  { %1440 = vmatmul.msk.f32.vlgmr.msrb.gmra.mxu0 %vm253_vm8, %v748_v29 }
 0x691   :  { %v974_v35 = vpop.permute.xlu1 %973 }
 0x693   :  { %1445 = vmatmul.msk.f32.vlgmr.msra.gmra.mxu0 %vm253_vm8, %v872_v31 }
 0x700   :  { %v629_v33 = vpop.f32.mrf.mxu0  ;;  %v744_v34 = vpop.f32.mrf.mxu2 }
 0x701   :  { %1435 = vmatmul.msk.f32.vlgmr.msra.gmra.mxu1 %vm253_vm8, %v629_v33  ;;  %1443 = vmatmul.msk.f32.vlgmr.msrb.gmra.mxu2 %vm253_vm8, %v744_v34 }
 0x708   :  { %v772_v36 = vpop.f32.mrf.mxu0 }
 0x709   :  { %1449 = vmatmul.msk.f32.vlgmr.msra.gmra.mxu2 %vm253_vm8, %v974_v35  ;;  %v775_v37 = vsel %vm253_vm8, %v772_v36, -inf }
 0x70a   :  { %776 = vmax.xlane.f32.xlu2 %v775_v37 }
 0x710   :  { %v896_v38 = vpop.f32.mrf.mxu0 }
 0x711   :  { %v899_v39 = vsel %vm253_vm8, %v896_v38, -inf }
 0x712   :  { %900 = vmax.xlane.f32.xlu0 %v899_v39 }
 0x77d   :  { %v777_v40 = vpop.xlane.xlu2 %776 }
 0x77e   :  { %v778_v41 = vsub.f32 %v772_v36, %v777_v40  ;;  %v652_v31 = vpop.f32.mrf.mxu1 }
 0x780   :  { %v779_v42 = vmul.f32 1.442695, %v778_v41 }
 0x782   :  { %1501 = vpow2.f32 %v779_v42 }
 0x784   :  { %v1835_v43 = vpop.f32.mrf.mxu2 }
 0x785   :  { %v901_v44 = vpop.xlane.xlu0 %900 }
 0x786   :  { %v902_v45 = vsub.f32 %v896_v38, %v901_v44 }
 0x788   :  { %v1502_v47 = vpop.eup %1501  ;;  %v903_v48 = vmul.f32 1.442695, %v902_v45 }
 0x789   :  { %v781_v49 = vsel %vm253_vm8, %v1502_v47, 0.0 }
 0x78a   :  { %1503 = vpow2.f32 %v903_v48  ;;  %782 = vadd.xlane.f32.xlu2 %v781_v49  ;;  %v655_v49 = vadd.f32 %v652_v31, %v1805_v46 }
 0x78c   :  { %v998_v50 = vpop.f32.mrf.mxu2 }
 0x78d   :  { %v1001_v51 = vsel %vm253_vm8, %v998_v50, -inf }
 0x78e   :  { %1002 = vmax.xlane.f32.xlu1 %v1001_v51 }
 0x790   :  { %v1504_v52 = vpop.eup %1503 }
 0x791   :  { %v905_v53 = vsel %vm253_vm8, %v1504_v52, 0.0 }
 0x792   :  { %906 = vadd.xlane.f32.xlu0 %v905_v53 }
 0x7a2   :  { %799 = vrot.lane.b32.xlu2 %v1747_v8, %s1662_s16 }
 0x7a6   :  { %923 = vrot.lane.b32.xlu0 %v1747_v8, %s1661_s15 }
 0x7fd   :  { %v783_v54 = vpop.xlane.xlu2 %782 }
 0x7fe   :  { %1505 = vrcp.f32 %v783_v54  ;;  %v795_v63 = vand.u32 2147483648, %v783_v54  ;;  %v793_v1 = vand.u32 2147483647, %v783_v54  ;;  %vm789_vm1 = vweird.f32 %v783_v54 }
 0x800   :  { %v796_v6 = vor.u32 1.1754944e-38, %v795_v63  ;;  %vm794_vm3 = vcmp.eq.f32.partialorder %v793_v1, 8.507059e+37 }
 0x801   :  { %v1003_v55 = vpop.xlane.xlu1 %1002 }
 0x802   :  { %v1004_v56 = vsub.f32 %v998_v50, %v1003_v55  ;;  %v1077_v55 = vrot.slane %v655_v49, 2 }
 0x804   :  { %v1506_v57 = vpop.eup %1505  ;;  %v1005_v58 = vmul.f32 1.442695, %v1004_v56  ;;  %v1078_v56 = vrot.slane %v655_v49, 3 }
 0x805   :  { %v785_v59 = vmul.f32 %v1506_v57, %v783_v54  ;;  %v907_v60 = vpop.xlane.xlu0 %906  ;;  %v800_v61 = vpop.permute.xlu2 %799  ;;  %vm790_vm15 = vweird.f32 %v1506_v57  ;;  %v1076_v54 = vrot.slane %v655_v49, 1 }
 0x806   :  { %1507 = vpow2.f32 %v1005_v58  ;;  %820 = vmatpush.msrb.mxu1 %v800_v61  ;;  %vm791_vm2 = vmor %vm789_vm1, %vm790_vm15  ;;  %v919_v13 = vand.u32 2147483648, %v907_v60  ;;  %v917_v15 = vand.u32 2147483647, %v907_v60  ;;  %vm913_vm5 = vweird.f32 %v907_v60 }
 0x807   :  { %v786_v62 = vsub.f32 1.0, %v785_v59  ;;  %1509 = vrcp.f32 %v907_v60  ;;  %v1080_v59 = vrot.slane %v655_v49, 5  ;;  %v1082_v61 = vrot.slane %v655_v49, 7 }
 0x808   :  { %v920_v24 = vor.u32 1.1754944e-38, %v919_v13  ;;  %vm918_vm7 = vcmp.eq.f32.partialorder %v917_v15, 8.507059e+37  ;;  %vm1386_vm15 = vcmask 254976  }
 0x809   :  { %v787_v0 = vmul.f32 %v1506_v57, %v786_v62 }
 0x80b   :  { %v788_v2 = vadd.f32 %v1506_v57, %v787_v0 }
 0x80c   :  { %v1508_v3 = vpop.eup %1507 }
 0x80d   :  { %v1510_v4 = vpop.eup %1509  ;;  %v792_v5 = vsel %vm791_vm2, %v1506_v57, %v788_v2  ;;  %v1007_v7 = vsel %vm253_vm8, %v1508_v3, 0.0  ;;  %v1079_v57 = vrot.slane %v655_v49, 4 }
 0x80e   :  { %v797_v9 = vsel %vm794_vm3, %v796_v6, %v792_v5  ;;  %v909_v10 = vmul.f32 %v1510_v4, %v907_v60  ;;  %1008 = vadd.xlane.f32.xlu1 %v1007_v7  ;;  %vm914_vm4 = vweird.f32 %v1510_v4  ;;  %v1081_v60 = vrot.slane %v655_v49, 6 }
 0x80f   :  { %v798_v11 = vmul.f32 %v1502_v47, %v797_v9  ;;  %vm915_vm6 = vmor %vm913_vm5, %vm914_vm4 }
 0x810   :  { %v910_v12 = vsub.f32 1.0, %v909_v10 }
 0x811   :  { %1441 = vmatmul.msk.f32.vlgmr.msrb.gmra.mxu1 %vm253_vm8, %v798_v11 }
 0x812   :  { %v911_v14 = vmul.f32 %v1510_v4, %v910_v12 }
 0x814   :  { %v912_v18 = vadd.f32 %v1510_v4, %v911_v14 }
 0x816   :  { %v916_v26 = vsel %vm915_vm6, %v1510_v4, %v912_v18 }
 0x817   :  { %v921_v27 = vsel %vm918_vm7, %v920_v24, %v916_v26 }
 0x818   :  { %v924_v28 = vpop.permute.xlu0 %923  ;;  %v922_v29 = vmul.f32 %v1504_v52, %v921_v27  ;;  %v1478_v52 = vld [vmem:[#allocation8 + $0x1] ss:$0 sm:$0xff] }
 0x819   :  { %944 = vmatpush.msra.mxu1 %v924_v28  ;;  %v1133_v63 = vrot.slane %v1478_v52, 2  ;;  %v1134_v0 = vrot.slane %v1478_v52, 4  ;;  %v1135_v1 = vrot.slane %v1478_v52, 6 }
 0x81a   :  { %1446 = vmatmul.msk.f32.vlgmr.msra.gmra.mxu1 %vm253_vm8, %v922_v29 }
 0x81b   :  { %1069 = vmatpush.msrb.mxu1 %v1827_v32 }
 0x827   :  { %1025 = vrot.lane.b32.xlu1 %v1747_v8, %s1665_s19 }
 0x881   :  { %v1009_v30 = vpop.xlane.xlu1 %1008 }
 0x882   :  { %1511 = vrcp.f32 %v1009_v30  ;;  %v1021_v39 = vand.u32 2147483648, %v1009_v30  ;;  %vm1015_vm10 = vweird.f32 %v1009_v30  ;;  %v1019_v40 = vand.u32 2147483647, %v1009_v30 }
 0x884   :  { %v1022_v41 = vor.u32 1.1754944e-38, %v1021_v39  ;;  %vm1020_vm12 = vcmp.eq.f32.partialorder %v1019_v40, 8.507059e+37 }
 0x888   :  { %v1512_v33 = vpop.eup %1511 }
 0x889   :  { %v1011_v34 = vmul.f32 %v1512_v33, %v1009_v30  ;;  %vm1016_vm9 = vweird.f32 %v1512_v33 }
 0x88a   :  { %vm1017_vm11 = vmor %vm1015_vm10, %vm1016_vm9 }
 0x88b   :  { %v1012_v35 = vsub.f32 1.0, %v1011_v34 }
 0x88d   :  { %v1013_v36 = vmul.f32 %v1512_v33, %v1012_v35 }
 0x88e   :  { %v822_v37 = vpop.f32.mrf.mxu1 }
 0x88f   :  { %v1014_v38 = vadd.f32 %v1512_v33, %v1013_v36  ;;  %1442 = vmatmul.msk.f32.vlgmr.msrb.gmra.mxu3 %vm253_vm8, %v822_v37 }
 0x891   :  { %v1018_v32 = vsel %vm1017_vm11, %v1512_v33, %v1014_v38 }
 0x892   :  { %v1023_v8 = vsel %vm1020_vm12, %v1022_v41, %v1018_v32 }
 0x893   :  { %v1024_v45 = vmul.f32 %v1508_v3, %v1023_v8 }
 0x897   :  { %v946_v42 = vpop.f32.mrf.mxu1 }
 0x898   :  { %1447 = vmatmul.msk.f32.vlgmr.msra.gmra.mxu3 %vm253_vm8, %v946_v42 }
 0x899   :  { %v1026_v44 = vpop.permute.xlu1 %1025 }
 0x89a   :  { %1046 = vmatpush.msrb.mxu0 %v1026_v44 }
 0x89b   :  { %1450 = vmatmul.msk.f32.vlgmr.msrb.gmra.mxu0 %vm253_vm8, %v1024_v45 }
 0x912   :  { %v845_v48 = vpop.f32.mrf.mxu3 }
 0x913   :  { %v869_v51 = vadd.f32 %v1835_v43, %v845_v48 }
 0x918   :  { %v1048_v47 = vpop.f32.mrf.mxu0 }
 0x919   :  { %1451 = vmatmul.msk.f32.vlgmr.msrb.gmra.mxu1 %vm253_vm8, %v1048_v47 }
 0x91b   :  { %v969_v50 = vpop.f32.mrf.mxu3 }
 0x91c   :  { %v972_v53 = vadd.f32 %v969_v50, %v869_v51  ;;  %v1667_v51 = vmov 269488144  }
 0x996   :  { %v1071_v58 = vpop.f32.mrf.mxu1 }
 0x997   :  { %v1074_v62 = vadd.f32 %v1071_v58, %v972_v53  ;;  %v1668_v53 = vmov 842150450  }
 0x999   :  { %v1091_v2 = vrot.slane %v1074_v62, 1  ;;  %v1092_v46 = vrot.slane %v1074_v62, 2  ;;  %v1093_v3 = vrot.slane %v1074_v62, 3  ;;  %v1094_v6 = vrot.slane %v1074_v62, 4 }
 0x99a   :  { %v1095_v43 = vrot.slane %v1074_v62, 5  ;;  %v1096_v4 = vrot.slane %v1074_v62, 6  ;;  %v1097_v5 = vrot.slane %v1074_v62, 7  ;;  %v1098_v7 = vperm.slane %v1074_v62, 0 }
 0x99b   :  { %v1099_v9 = vperm.slane %v1091_v2, 0  ;;  %v1100_v10 = vperm.slane %v1092_v46, 0  ;;  %v1101_v11 = vperm.slane %v1093_v3, 0  ;;  %v1102_v12 = vperm.slane %v1094_v6, 0 }
 0x99c   :  { %v1103_v13 = vperm.slane %v1095_v43, 0  ;;  %v1104_v14 = vperm.slane %v1096_v4, 0  ;;  %v1105_v15 = vperm.slane %v1097_v5, 0  ;;  %v1115_v18 = vsel %vm1114_vm13, %v655_v49, %v1098_v7 }
 0x99d   :  { %v1116_v24 = vsel %vm1114_vm13, %v1076_v54, %v1099_v9  ;;  %v1117_v26 = vsel %vm1114_vm13, %v1077_v55, %v1100_v10  ;;  %v1118_v27 = vsel %vm1114_vm13, %v1078_v56, %v1101_v11  ;;  %v1119_v28 = vsel %vm1114_vm13, %v1079_v57, %v1102_v12 }
 0x99e   :  { %v1120_v29 = vsel %vm1114_vm13, %v1080_v59, %v1103_v13  ;;  %v1121_v30 = vsel %vm1114_vm13, %v1081_v60, %v1104_v14  ;;  %v1122_v31 = vsel %vm1114_vm13, %v1082_v61, %v1105_v15  ;;  %v1123_v33 = vadd.f32 %v1115_v18, %v1715_v16 }
 0x99f   :  { %v1124_v34 = vadd.f32 %v1116_v24, %v1717_v17  ;;  %v1125_v35 = vadd.f32 %v1117_v26, %v1719_v19  ;;  %v1126_v36 = vadd.f32 %v1118_v27, %v1722_v20  ;;  %v1127_v37 = vadd.f32 %v1119_v28, %v1726_v21 }
 0x9a0   :  { %v1128_v38 = vadd.f32 %v1120_v29, %v1729_v22  ;;  %v1129_v39 = vadd.f32 %v1121_v30, %v1731_v23  ;;  %v1139_v40 = vadd.f32 %v1478_v52, %v1123_v33  ;;  %v1130_v32 = vadd.f32 %v1122_v31, %v1734_v25 }
 0x9a1   :  { %v1140_v41 = vadd.f32 %v1133_v63, %v1124_v34  ;;  %v1141_v8 = vadd.f32 %v1134_v0, %v1125_v35  ;;  %v1142_v42 = vadd.f32 %v1135_v1, %v1126_v36  ;;  %v1143_v44 = vadd.f32 %v1478_v52, %v1127_v37 }
 0x9a2   :  { %1155 = vst [vmem:[#allocation1] ss:$4 sm:$0xff] %v1139_v40  ;;  %v1144_v16 = vadd.f32 %v1133_v63, %v1128_v38  ;;  %v1145_v17 = vadd.f32 %v1134_v0, %v1129_v39  ;;  %v1146_v19 = vadd.f32 %v1135_v1, %v1130_v32  ;;  %v1666_v25 = vmov 32.0  }
 0x9a3   :  { %1157 = vst [vmem:[#allocation1 + $0x1] ss:$4 sm:$0xff] %v1140_v41  ;;  %1513 = vrcp.f32 %v1666_v25  ;;  %v1192_v52 = vunpack.c.l.s4 %v1667_v51  ;;  %v1196_v54 = vunpack.c.l.s4 %v1668_v53  ;;  %v1669_v55 = vmov 1414812756   ;;  %v1479_v25 = vld [vmem:[#allocation8 + $0x2] ss:$0 sm:$0xff] }
 0x9a4   :  { %1159 = vst [vmem:[#allocation1 + $0x2] ss:$4 sm:$0xff] %v1141_v8  ;;  %v1200_v56 = vunpack.c.l.s4 %v1669_v55  ;;  %v1670_v57 = vmov 1987475062   ;;  %v1356_v51 = vrot.slane %v1479_v25, 2 }
 0x9a5   :  { %1161 = vst [vmem:[#allocation1 + $0x3] ss:$4 sm:$0xff] %v1142_v42  ;;  %v1204_v58 = vunpack.c.l.s4 %v1670_v57  ;;  %v1874_v60 = vunpack.c.0.s8 %v1192_v52  ;;  %v1876_v61 = vunpack.c.0.s8 %v1196_v54  ;;  %v1357_v52 = vrot.slane %v1479_v25, 4 }
 0x9a6   :  { %1163 = vst [vmem:[#allocation1 + $0x20] ss:$4 sm:$0xff] %v1143_v44  ;;  %v1878_v62 = vunpack.c.0.s8 %v1200_v56  ;;  %v1358_v54 = vrot.slane %v1479_v25, 6 }
 0x9a7   :  { %1165 = vst [vmem:[#allocation1 + $0x21] ss:$4 sm:$0xff] %v1144_v16  ;;  %v1880_v63 = vunpack.c.0.s8 %v1204_v58 }
 0x9a8   :  { %1167 = vst [vmem:[#allocation1 + $0x22] ss:$4 sm:$0xff] %v1145_v17 }
 0x9a9   :  { %1169 = vst [vmem:[#allocation1 + $0x23] ss:$4 sm:$0xff] %v1146_v19  ;;  %v1514_v45 = vpop.eup %1513 }
 0x9aa   :  { %v1181_v47 = vmul.f32 32.0, %v1514_v45  ;;  %vm1185_vm8 = vweird.f32 %v1514_v45 }
 0x9ac   :  { %v1170_v20 = vld.sshfl [vmem:[#allocation1] sm:$0xff pattern:$0x73625140]  ;;  %v1182_v48 = vsub.f32 1.0, %v1181_v47  ;;  %v1480_v47 = vld [vmem:[#allocation8 + $0x3] ss:$0 sm:$0xff] }
 0x9ad   :  { %v1174_v21 = vsel %vm129_vm0, %v1170_v20, 0.0  ;;  %v1372_v55 = vrot.slane %v1480_v47, 2  ;;  %v1373_v56 = vrot.slane %v1480_v47, 4 }
 0x9ae   :  { %1175 = vadd.xlane.f32.xlu0 %v1174_v21  ;;  %v1183_v49 = vmul.f32 %v1514_v45, %v1182_v48 }
 0x9b0   :  { %v1171_v22 = vld.sshfl [vmem:[#allocation1 + $0x20] sm:$0xff pattern:$0x73625140]  ;;  %v1184_v50 = vadd.f32 %v1514_v45, %v1183_v49 }
 0x9b1   :  { %v1177_v23 = vsel %vm129_vm0, %v1171_v22, 0.0 }
 0x9b2   :  { %1178 = vadd.xlane.f32.xlu2 %v1177_v23  ;;  %v1186_v59 = vsel %vm1185_vm8, %v1514_v45, %v1184_v50 }
 0xa21   :  { %v1176_v0 = vpop.xlane.xlu0 %1175 }
 0xa22   :  { %v1187_v1 = vmul.f32 %v1186_v59, %v1176_v0 }
 0xa24   :  { %v1194_v2 = vperm.slane %v1187_v1, %v1874_v60  ;;  %v1198_v46 = vperm.slane %v1187_v1, %v1876_v61  ;;  %v1202_v3 = vperm.slane %v1187_v1, %v1878_v62  ;;  %v1206_v43 = vperm.slane %v1187_v1, %v1880_v63 }
 0xa25   :  { %v1179_v6 = vpop.xlane.xlu2 %1178 }
 0xa26   :  { %v1188_v4 = vmul.f32 %v1186_v59, %v1179_v6  ;;  %v1886_v5 = vsub.f32 %v1139_v40, %v1194_v2  ;;  %v1888_v7 = vsub.f32 %v1140_v41, %v1198_v46  ;;  %v1890_v9 = vsub.f32 %v1141_v8, %v1202_v3 }
 0xa27   :  { %v1896_v14 = vsub.f32 %v1142_v42, %v1206_v43 }
 0xa28   :  { %v1210_v10 = vperm.slane %v1188_v4, %v1874_v60  ;;  %v1214_v11 = vperm.slane %v1188_v4, %v1876_v61  ;;  %v1218_v12 = vperm.slane %v1188_v4, %v1878_v62  ;;  %v1222_v13 = vperm.slane %v1188_v4, %v1880_v63 }
 0xa29   :  { %v1239_v15 = vmul.f32 %v1886_v5, %v1886_v5  ;;  %v1240_v18 = vmul.f32 %v1888_v7, %v1888_v7  ;;  %v1241_v24 = vmul.f32 %v1890_v9, %v1890_v9  ;;  %v1242_v35 = vmul.f32 %v1896_v14, %v1896_v14 }
 0xa2a   :  { %v1904_v26 = vsub.f32 %v1143_v44, %v1210_v10  ;;  %v1906_v27 = vsub.f32 %v1144_v16, %v1214_v11  ;;  %v1908_v28 = vsub.f32 %v1145_v17, %v1218_v12  ;;  %v1910_v29 = vsub.f32 %v1146_v19, %v1222_v13 }
 0xa2b   :  { %1255 = vst [vmem:[#allocation1] ss:$4 sm:$0xff] %v1239_v15  ;;  %v1374_v15 = vrot.slane %v1480_v47, 6 }
 0xa2c   :  { %v1243_v30 = vmul.f32 %v1904_v26, %v1904_v26  ;;  %v1244_v31 = vmul.f32 %v1906_v27, %v1906_v27  ;;  %v1245_v33 = vmul.f32 %v1908_v28, %v1908_v28  ;;  %1257 = vst [vmem:[#allocation1 + $0x1] ss:$4 sm:$0xff] %v1240_v18  ;;  %v1246_v34 = vmul.f32 %v1910_v29, %v1910_v29 }
 0xa2d   :  { %1259 = vst [vmem:[#allocation1 + $0x2] ss:$4 sm:$0xff] %v1241_v24 }
 0xa2e   :  { %1263 = vst [vmem:[#allocation1 + $0x20] ss:$4 sm:$0xff] %v1243_v30 }
 0xa2f   :  { %1265 = vst [vmem:[#allocation1 + $0x21] ss:$4 sm:$0xff] %v1244_v31 }
 0xa30   :  { %1267 = vst [vmem:[#allocation1 + $0x22] ss:$4 sm:$0xff] %v1245_v33 }
 0xa31   :  { %1269 = vst [vmem:[#allocation1 + $0x23] ss:$4 sm:$0xff] %v1246_v34 }
 0xa32   :  { %1261 = vst [vmem:[#allocation1 + $0x3] ss:$4 sm:$0xff] %v1242_v35 }
 0xa38   :  { %v1271_v36 = vld.sshfl [vmem:[#allocation1 + $0x20] sm:$0xff pattern:$0x73625140] }
 0xa39   :  { %v1277_v37 = vsel %vm129_vm0, %v1271_v36, 0.0  ;;  %v1270_v38 = vld.sshfl [vmem:[#allocation1] sm:$0xff pattern:$0x73625140] }
 0xa3a   :  { %1278 = vadd.xlane.f32.xlu0 %v1277_v37  ;;  %v1274_v39 = vsel %vm129_vm0, %v1270_v38, 0.0 }
 0xa3b   :  { %1275 = vadd.xlane.f32.xlu1 %v1274_v39 }
 0xaad   :  { %v1279_v40 = vpop.xlane.xlu0 %1278 }
 0xaae   :  { %v1276_v32 = vpop.xlane.xlu1 %1275  ;;  %v1281_v41 = vmul.f32 %v1279_v40, %v1186_v59 }
 0xaaf   :  { %v1280_v8 = vmul.f32 %v1276_v32, %v1186_v59 }
 0xab0   :  { %v1283_v42 = vadd.f32 1e-05, %v1281_v41 }
 0xab1   :  { %v1282_v44 = vadd.f32 1e-05, %v1280_v8 }
 0xab2   :  { %1515 = vrsqrt.f32 %v1283_v42  ;;  %vm1300_vm1 = vweird.f32 %v1283_v42 }
 0xab3   :  { %1517 = vrsqrt.f32 %v1282_v44  ;;  %vm1290_vm2 = vweird.f32 %v1282_v44 }
 0xab8   :  { %v1516_v16 = vpop.eup %1515 }
 0xab9   :  { %v1518_v17 = vpop.eup %1517  ;;  %v1295_v19 = vmul.f32 %v1516_v16, %v1283_v42  ;;  %vm1301_vm0 = vweird.f32 %v1516_v16 }
 0xaba   :  { %v1285_v20 = vmul.f32 %v1518_v17, %v1282_v44  ;;  %vm1291_vm14 = vweird.f32 %v1518_v17  ;;  %vm1302_vm3 = vmor %vm1300_vm1, %vm1301_vm0 }
 0xabb   :  { %v1296_v21 = vmul.f32 %v1516_v16, %v1295_v19  ;;  %vm1292_vm4 = vmor %vm1290_vm2, %vm1291_vm14 }
 0xabc   :  { %v1286_v22 = vmul.f32 %v1518_v17, %v1285_v20 }
 0xabd   :  { %v1297_v23 = vmul.f32 0.5, %v1296_v21 }
 0xabe   :  { %v1287_v45 = vmul.f32 0.5, %v1286_v22 }
 0xabf   :  { %v1298_v48 = vsub.f32 1.5, %v1297_v23 }
 0xac0   :  { %v1288_v49 = vsub.f32 1.5, %v1287_v45 }
 0xac1   :  { %v1299_v50 = vmul.f32 %v1516_v16, %v1298_v48 }
 0xac2   :  { %v1289_v53 = vmul.f32 %v1518_v17, %v1288_v49 }
 0xac3   :  { %v1303_v57 = vsel %vm1302_vm3, %v1516_v16, %v1299_v50 }
 0xac4   :  { %v1293_v58 = vsel %vm1292_vm4, %v1518_v17, %v1289_v53  ;;  %v1325_v59 = vperm.slane %v1303_v57, %v1874_v60  ;;  %v1329_v0 = vperm.slane %v1303_v57, %v1876_v61  ;;  %v1333_v1 = vperm.slane %v1303_v57, %v1878_v62 }
 0xac5   :  { %v1309_v2 = vperm.slane %v1293_v58, %v1874_v60  ;;  %v1313_v46 = vperm.slane %v1293_v58, %v1876_v61  ;;  %v1317_v3 = vperm.slane %v1293_v58, %v1878_v62  ;;  %v1321_v6 = vperm.slane %v1293_v58, %v1880_v63 }
 0xac6   :  { %v1337_v43 = vperm.slane %v1303_v57, %v1880_v63  ;;  %v1350_v4 = vmul.f32 %v1325_v59, %v1904_v26  ;;  %v1351_v10 = vmul.f32 %v1329_v0, %v1906_v27  ;;  %v1352_v11 = vmul.f32 %v1333_v1, %v1908_v28 }
 0xac7   :  { %v1346_v12 = vmul.f32 %v1309_v2, %v1886_v5  ;;  %v1347_v13 = vmul.f32 %v1313_v46, %v1888_v7  ;;  %v1348_v60 = vmul.f32 %v1317_v3, %v1890_v9  ;;  %v1349_v61 = vmul.f32 %v1321_v6, %v1896_v14 }
 0xac8   :  { %v1353_v62 = vmul.f32 %v1337_v43, %v1910_v29  ;;  %v1366_v18 = vmul.f32 %v1479_v25, %v1350_v4  ;;  %v1367_v24 = vmul.f32 %v1356_v51, %v1351_v10  ;;  %v1368_v27 = vmul.f32 %v1357_v52, %v1352_v11 }
 0xac9   :  { %v1362_v63 = vmul.f32 %v1479_v25, %v1346_v12  ;;  %v1363_v30 = vmul.f32 %v1356_v51, %v1347_v13  ;;  %v1364_v26 = vmul.f32 %v1357_v52, %v1348_v60  ;;  %v1365_v31 = vmul.f32 %v1358_v54, %v1349_v61 }
 0xaca   :  { %v1382_v33 = vadd.f32 %v1480_v47, %v1366_v18  ;;  %v1369_v35 = vmul.f32 %v1358_v54, %v1353_v62  ;;  %v1383_v9 = vadd.f32 %v1372_v55, %v1367_v24  ;;  %v1384_v14 = vadd.f32 %v1373_v56, %v1368_v27 }
 0xacb   :  { %v1378_v28 = vadd.f32 %v1480_v47, %v1362_v63  ;;  %v1379_v34 = vadd.f32 %v1372_v55, %v1363_v30  ;;  %v1380_v5 = vadd.f32 %v1373_v56, %v1364_v26  ;;  %v1381_v7 = vadd.f32 %v1374_v15, %v1365_v31 }
 0xacc   :  { %1391 = vst.msk [vmem:[#allocation10 + $0x8] sm:$0x3] %vm1386_vm15, %v1382_v33  ;;  %v1385_v29 = vadd.f32 %v1374_v15, %v1369_v35 }
 0xacd   :  { %1387 = vst.msk [vmem:[#allocation10] sm:$0x3] %vm1386_vm15, %v1378_v28 }
 0xace   :  { %1388 = vst.msk [vmem:[#allocation10 + $0x2] sm:$0x3] %vm1386_vm15, %v1379_v34 }
 0xacf   :  { %1389 = vst.msk [vmem:[#allocation10 + $0x4] sm:$0x3] %vm1386_vm15, %v1380_v5 }
 0xad0   :  { %1390 = vst.msk [vmem:[#allocation10 + $0x6] sm:$0x3] %vm1386_vm15, %v1381_v7 }
 0xad1   :  { %1392 = vst.msk [vmem:[#allocation10 + $0xa] sm:$0x3] %vm1386_vm15, %v1383_v9 }
 0xad2   :  { %1393 = vst.msk [vmem:[#allocation10 + $0xc] sm:$0x3] %vm1386_vm15, %v1384_v14 }
 0xad3   :  { %1394 = vst.msk [vmem:[#allocation10 + $0xe] sm:$0x3] %vm1386_vm15, %v1385_v29 }
 0xad4   :  { %1407 = dma.vmem_to_hbm [thread:$0]  %s1400_s21, 256, %s1402_s26, [#allocation4], %s1648_s23, %s1648_s23, %s1649_s24  }
 0xad5   :  { %1645 = dma.done.wait [#allocation4], 256  }
 0xad6   :  { %1646 = vsyncadd [#allocation4], 4294967040 }
 0xad7   :  { %1412 = vsyncpa [#allocation3], 1 }
 0xad8   :  { %1413 = vsyncpa [#allocation6], 1 }
 0xad9   :  { %1414 = vsyncpa [#allocation9], 1 }
 0xada   :  { %1415 = vsyncpa [#allocation4], 1 }

</bundles_post_ra>
